<compile_context>
chip_gen: v7x
topology: tpu7x:2x2x1
jax: 0.10.0
libtpu: 0.0.40
codegen_flags: <defaults>
</compile_context>

<pallas_src>
import functools
import math

import jax
import jax.numpy as jnp
from jax.experimental import pallas as pl
from jax.experimental.pallas import tpu as pltpu


# ----------------------------- Pallas kernel ------------------------------- #
def _encoder_layer_kernel(
    x_ref,        # (S, Bt, D) f32 input block (Bt batch elements)
    wqkv_ref,     # (D, 3D)    bf16, in_proj weight (pre-transposed, Q cols pre-scaled)
    bqkv_ref,     # (1, 3D)    f32  (Q slice pre-scaled)
    wo_ref,       # (D, D)     bf16, out_proj weight (pre-transposed)
    bo_ref,       # (1, D)     f32
    w1_ref,       # (D, F)     bf16, linear1 weight (pre-transposed)
    b1_ref,       # (1, F)     f32
    w2_ref,       # (F, D)     bf16, linear2 weight (pre-transposed)
    b2_ref,       # (1, D)     f32
    g1_ref,       # (1, D)     norm1 gamma
    be1_ref,      # (1, D)     norm1 beta
    g2_ref,       # (1, D)     norm2 gamma
    be2_ref,      # (1, D)     norm2 beta
    o_ref,        # (S, Bt, D) f32 output block
    *,
    nhead: int,
):
    S, Bt, D = x_ref.shape
    hd = D // nhead
    R = S * Bt                      # rows per grid step, order (s, b)
    eps = 1e-5

    # Flatten (S, Bt, D) -> (R, D): row-parallel ops (projections, FFN, LN,
    # residual) run once on all Bt*S rows -> full MXU M-dimension.
    x = x_ref[...].reshape(R, D)                    # f32, kept for the residual
    x_bf = x.astype(jnp.bfloat16)

    # ---- self-attention: fused QKV projection (M = R rows) ------------------
    qkv = jnp.dot(x_bf, wqkv_ref[...],
                  preferred_element_type=jnp.float32) + bqkv_ref[...]   # (R, 3D) f32
    # Single bf16 cast of the whole qkv slab; everything downstream slices bf16.
    qkv_bf = qkv.astype(jnp.bfloat16).reshape(S, Bt, 3 * D)

    # Per batch element (Bt is small and static); heads are batched in one
    # einsum pair so all head matmuls hit the MXU as a single batched dot.
    attn_cols = []
    for b in range(Bt):
        qkv_b = qkv_bf[:, b, :]                     # (S, 3D) bf16

        def heads(off):                              # -> (H, S, hd) bf16
            return jnp.stack(
                [qkv_b[:, off + h * hd: off + (h + 1) * hd] for h in range(nhead)],
                axis=0)

        q = heads(0)            # 1/sqrt(hd) already folded into wqkv/bqkv Q slice
        k = heads(D)
        v = heads(2 * D)

        s = jnp.einsum("hqd,hkd->hqk", q, k,
                       preferred_element_type=jnp.float32)              # (H, S, S) f32
        s = s - jnp.max(s, axis=-1, keepdims=True)
        p = jnp.exp(s)
        p = p * pl.reciprocal(jnp.sum(p, axis=-1, keepdims=True), approx=True)
        ah = jnp.einsum("hqk,hkd->hqd", p.astype(jnp.bfloat16), v,
                        preferred_element_type=jnp.float32)             # (H, S, hd) f32

        attn_cols.append(
            jnp.concatenate([ah[h] for h in range(nhead)], axis=-1)
            .astype(jnp.bfloat16))                  # (S, D) bf16, cast where produced

    attn = jnp.stack(attn_cols, axis=1).reshape(R, D)                   # (R, D) bf16
    attn = jnp.dot(attn, wo_ref[...],
                   preferred_element_type=jnp.float32) + bo_ref[...]    # (R, D) f32

    # ---- residual + norm1 (f32) ---------------------------------------------
    y = x + attn                                    # dropout1 = identity (eval)
    mu = jnp.mean(y, axis=-1, keepdims=True)
    var = jnp.mean((y - mu) ** 2, axis=-1, keepdims=True)
    y = (y - mu) * jax.lax.rsqrt(var + eps) * g1_ref[...] + be1_ref[...]

    # ---- feed-forward: linear2(relu(linear1(y))), M = R rows -----------------
    h1 = jnp.dot(y.astype(jnp.bfloat16), w1_ref[...],
                 preferred_element_type=jnp.float32) + b1_ref[...]
    h1 = jnp.maximum(h1, 0.0).astype(jnp.bfloat16)  # relu; inner dropout = identity
    h2 = jnp.dot(h1, w2_ref[...],
                 preferred_element_type=jnp.float32) + b2_ref[...]

    # ---- residual + norm2 (f32) ---------------------------------------------
    z = y + h2                                      # dropout2 = identity
    mu2 = jnp.mean(z, axis=-1, keepdims=True)
    var2 = jnp.mean((z - mu2) ** 2, axis=-1, keepdims=True)
    z = (z - mu2) * jax.lax.rsqrt(var2 + eps) * g2_ref[...] + be2_ref[...]

    # Store straight back in (S, Bt, D) layout (no wrapper transpose needed).
    o_ref[...] = z.reshape(S, Bt, D).astype(o_ref.dtype)


# --------------------------- one-time weight prep --------------------------- #
def prepare_params(params, *, nhead):
    """Fold the softmax scale into the Q slice and cast weights to bf16.

    Runs once, outside the per-call jit (the review flagged these O(weight)
    passes as per-call overhead).  Weights are already stored pre-transposed so
    the kernel computes x @ W (== x @ W_pt.T in PyTorch terms).
    """
    D = params["wo"].shape[0]
    hd = D // nhead
    scale = 1.0 / math.sqrt(hd)
    wqkv = params["wqkv"].at[:, :D].multiply(scale)
    bqkv = params["bqkv"].at[:, :D].multiply(scale)
    return {
        "wqkv": wqkv.astype(jnp.bfloat16), "bqkv": bqkv,
        "wo": params["wo"].astype(jnp.bfloat16), "bo": params["bo"],
        "w1": params["w1"].astype(jnp.bfloat16), "b1": params["b1"],
        "w2": params["w2"].astype(jnp.bfloat16), "b2": params["b2"],
        "g1": params["g1"], "be1": params["be1"],
        "g2": params["g2"], "be2": params["be2"],
    }


def _choose_batch_tile(B, S, rows_target=256):
    """Pick Bt | B so each grid step feeds ~rows_target rows to the MXU.

    Bt must keep the (Bt, D) trailing block dims legal: either the full batch
    extent or a multiple of 8 (sublane tiling)."""
    best = B
    for bt in range(1, B + 1):
        if B % bt:
            continue
        if bt != B and bt % 8 != 0:
            continue
        best = bt
        if bt * S >= rows_target:
            break
    return best


# ------------------------------- wrapper ------------------------------------ #
def _layer_impl(src, params, *, nhead):
    """src: (S, B, D) f32 -> (S, B, D) f32 (PyTorch MultiheadAttention layout)."""
    S, B, D = src.shape
    F = params["w1"].shape[1]
    assert D % nhead == 0
    hd = D // nhead

    Bt = _choose_batch_tile(B, S)
    grid = (B // Bt,)

    full = lambda shape: pl.BlockSpec(shape, lambda g: (0,) * len(shape))
    grid_spec = pltpu.PrefetchScalarGridSpec(
        num_scalar_prefetch=0,
        grid=grid,
        in_specs=[
            pl.BlockSpec((S, Bt, D), lambda g: (0, g, 0)),   # x, straight from (S,B,D)
            full((D, 3 * D)), full((1, 3 * D)),              # qkv proj
            full((D, D)), full((1, D)),                      # out proj
            full((D, F)), full((1, F)),                      # linear1
            full((F, D)), full((1, D)),                      # linear2
            full((1, D)), full((1, D)),                      # norm1
            full((1, D)), full((1, D)),                      # norm2
        ],
        out_specs=pl.BlockSpec((S, Bt, D), lambda g: (0, g, 0)),
    )

    flops = int(
        2 * B * S * D * 3 * D          # qkv projection
        + 4 * B * nhead * S * S * hd   # q.kT + p.v
        + 2 * B * S * D * D            # out projection
        + 4 * B * S * D * F            # linear1 + linear2
    )
    w_bytes = 2 * (3 * D * D + D * D + 2 * D * F)            # bf16 weights
    bytes_accessed = int(
        4 * 2 * B * S * D                                    # activation in/out (f32)
        + w_bytes
        + 4 * (3 * D + D + F + D + 4 * D)                    # f32 biases + LN params
    )
    cost = pl.CostEstimate(flops=flops,
                           transcendentals=int(B * nhead * S * S),
                           bytes_accessed=bytes_accessed)

    # Explicit VMEM budget: full-resident weights (pipeline double-buffers them),
    # double-buffered activation blocks, plus in-kernel intermediates.  Raised
    # above the v5e 16 MiB default, clamped to the v7x 64 MiB physical VMEM.
    act_bytes = 4 * S * Bt * 2 * D                           # f32 in/out blocks
    inter_bytes = 4 * S * Bt * (3 * D + D + F + 4 * D) + 4 * Bt * nhead * S * S
    vmem_limit = 2 * (w_bytes + act_bytes) + 2 * inter_bytes + (8 << 20)
    vmem_limit = int(min(max(vmem_limit, 32 << 20), 64 << 20))

    return pl.pallas_call(
        functools.partial(_encoder_layer_kernel, nhead=nhead),
        out_shape=jax.ShapeDtypeStruct((S, B, D), jnp.float32),
        grid_spec=grid_spec,
        compiler_params=pltpu.CompilerParams(
            dimension_semantics=("parallel",),               # batch-group axis
            vmem_limit_bytes=vmem_limit),
        cost_estimate=cost,
    )(
        src,
        params["wqkv"], params["bqkv"],
        params["wo"], params["bo"],
        params["w1"], params["b1"],
        params["w2"], params["b2"],
        params["g1"], params["be1"],
        params["g2"], params["be2"],
    )


transformer_encoder_layer = jax.jit(_layer_impl, static_argnames=("nhead",))


# ---------------------------- pure-JAX reference ---------------------------- #
def _reference(src, params, *, nhead):
    S, B, D = src.shape
    hd = D // nhead
    x = jnp.transpose(src, (1, 0, 2)).astype(jnp.float32)          # (B, S, D)

    qkv = jnp.einsum("bsd,de->bse", x, params["wqkv"]) + params["bqkv"]
    q, k, v = qkv[..., :D], qkv[..., D:2 * D], qkv[..., 2 * D:]

    def split_heads(t):                                            # (B, H, S, hd)
        return jnp.transpose(t.reshape(B, S, nhead, hd), (0, 2, 1, 3))

    qh, kh, vh = split_heads(q) / math.sqrt(hd), split_heads(k), split_heads(v)
    s = jnp.einsum("bhqd,bhkd->bhqk", qh, kh)
    p = jax.nn.softmax(s, axis=-1)
    a = jnp.einsum("bhqk,bhkd->bhqd", p, vh)
    a = jnp.transpose(a, (0, 2, 1, 3)).reshape(B, S, D)
    a = jnp.einsum("bsd,de->bse", a, params["wo"]) + params["bo"]

    def ln(t, g, b):
        mu = jnp.mean(t, axis=-1, keepdims=True)
        var = jnp.mean((t - mu) ** 2, axis=-1, keepdims=True)
        return (t - mu) * jax.lax.rsqrt(var + 1e-5) * g + b

    y = ln(x + a, params["g1"], params["be1"])
    h = jnp.maximum(jnp.einsum("bsd,df->bsf", y, params["w1"]) + params["b1"], 0.0)
    h = jnp.einsum("bsf,fd->bsd", h, params["w2"]) + params["b2"]
    z = ln(y + h, params["g2"], params["be2"])
    return jnp.transpose(z, (1, 0, 2))


# --------------------------------- main ------------------------------------- #
if __name__ == "__main__":
    S, B, D, NHEAD, FF = 8, 2, 32, 4, 64

    key = jax.random.PRNGKey(0)
    ks = jax.random.split(key, 8)

    # Weights stored pre-transposed so the kernel computes x @ W (matches
    # PyTorch's x @ W_pt.T).
    params = {
        "wqkv": 0.1 * jax.random.normal(ks[0], (D, 3 * D), jnp.float32),
        "bqkv": 0.1 * jax.random.normal(ks[1], (1, 3 * D), jnp.float32),
        "wo":   0.1 * jax.random.normal(ks[2], (D, D), jnp.float32),
        "bo":   0.1 * jax.random.normal(ks[3], (1, D), jnp.float32),
        "w1":   0.1 * jax.random.normal(ks[4], (D, FF), jnp.float32),
        "b1":   0.1 * jax.random.normal(ks[5], (1, FF), jnp.float32),
        "w2":   0.1 * jax.random.normal(ks[6], (FF, D), jnp.float32),
        "b2":   0.1 * jax.random.normal(ks[7], (1, D), jnp.float32),
        "g1":   jnp.ones((1, D), jnp.float32),
        "be1":  jnp.zeros((1, D), jnp.float32),
        "g2":   jnp.ones((1, D), jnp.float32),
        "be2":  jnp.zeros((1, D), jnp.float32),
    }

    src = jax.random.normal(jax.random.PRNGKey(1), (S, B, D), jnp.float32)

    # One-time weight prep (scale fold + bf16 casts), outside the per-call path.
    prepped = jax.block_until_ready(
        jax.tree_util.tree_map(jnp.asarray, prepare_params(params, nhead=NHEAD)))

    out = transformer_encoder_layer(src, prepped, nhead=NHEAD)
    out = jax.block_until_ready(out)

    ref = jax.block_until_ready(_reference(src, params, nhead=NHEAD))
    assert out.shape == (S, B, D)
    # bf16 matmul operands + approx reciprocal -> loosened tolerance vs f32 ref.
    err = float(jnp.max(jnp.abs(out - ref)))
    assert err < 5e-2, f"mismatch vs reference: max abs err = {err}"

    print("KERNEL_OK")
</pallas_src>

<mosaic_0001>
module attributes {stable_mosaic.version = 11 : i64} {
  func.func @_encoder_layer_kernel(%arg0: i32, %arg1: memref<8x2x32xf32, #tpu.memory_space<vmem>>, %arg2: memref<32x96xbf16, #tpu.memory_space<vmem>>, %arg3: memref<1x96xf32, #tpu.memory_space<vmem>>, %arg4: memref<32x32xbf16, #tpu.memory_space<vmem>>, %arg5: memref<1x32xf32, #tpu.memory_space<vmem>>, %arg6: memref<32x64xbf16, #tpu.memory_space<vmem>>, %arg7: memref<1x64xf32, #tpu.memory_space<vmem>>, %arg8: memref<64x32xbf16, #tpu.memory_space<vmem>>, %arg9: memref<1x32xf32, #tpu.memory_space<vmem>>, %arg10: memref<1x32xf32, #tpu.memory_space<vmem>>, %arg11: memref<1x32xf32, #tpu.memory_space<vmem>>, %arg12: memref<1x32xf32, #tpu.memory_space<vmem>>, %arg13: memref<1x32xf32, #tpu.memory_space<vmem>>, %arg14: memref<8x2x32xf32, #tpu.memory_space<vmem>>) attributes {dimension_semantics = [#tpu.dimension_semantics<parallel>], iteration_bounds = array<i64: 1>, scalar_prefetch = 0 : i64, scratch_operands = 0 : i64, tpu.core_type = #tpu.core_type<tc>, window_params = [{transform_indices = @transform_0, window_bounds = array<i64: 8, 2, 32>}, {pipeline_mode = #tpu.pipeline_mode<synchronous>, transform_indices = @transform_1, window_bounds = array<i64: 32, 96>}, {pipeline_mode = #tpu.pipeline_mode<synchronous>, transform_indices = @transform_2, window_bounds = array<i64: 1, 96>}, {pipeline_mode = #tpu.pipeline_mode<synchronous>, transform_indices = @transform_3, window_bounds = array<i64: 32, 32>}, {pipeline_mode = #tpu.pipeline_mode<synchronous>, transform_indices = @transform_4, window_bounds = array<i64: 1, 32>}, {pipeline_mode = #tpu.pipeline_mode<synchronous>, transform_indices = @transform_5, window_bounds = array<i64: 32, 64>}, {pipeline_mode = #tpu.pipeline_mode<synchronous>, transform_indices = @transform_6, window_bounds = array<i64: 1, 64>}, {pipeline_mode = #tpu.pipeline_mode<synchronous>, transform_indices = @transform_7, window_bounds = array<i64: 64, 32>}, {pipeline_mode = #tpu.pipeline_mode<synchronous>, transform_indices = @transform_8, window_bounds = array<i64: 1, 32>}, {pipeline_mode = #tpu.pipeline_mode<synchronous>, transform_indices = @transform_9, window_bounds = array<i64: 1, 32>}, {pipeline_mode = #tpu.pipeline_mode<synchronous>, transform_indices = @transform_10, window_bounds = array<i64: 1, 32>}, {pipeline_mode = #tpu.pipeline_mode<synchronous>, transform_indices = @transform_11, window_bounds = array<i64: 1, 32>}, {pipeline_mode = #tpu.pipeline_mode<synchronous>, transform_indices = @transform_12, window_bounds = array<i64: 1, 32>}, {transform_indices = @transform_13, window_bounds = array<i64: 8, 2, 32>}]} {
    %c0 = arith.constant 0 : index
    %c0_0 = arith.constant 0 : index
    %c0_1 = arith.constant 0 : index
    %0 = vector.load %arg1[%c0, %c0_0, %c0_1] : memref<8x2x32xf32, #tpu.memory_space<vmem>>, vector<8x2x32xf32>
    %1 = vector.shape_cast %0 : vector<8x2x32xf32> to vector<16x32xf32>
    %2 = arith.truncf %1 : vector<16x32xf32> to vector<16x32xbf16>
    %c0_2 = arith.constant 0 : index
    %c0_3 = arith.constant 0 : index
    %3 = vector.load %arg2[%c0_2, %c0_3] : memref<32x96xbf16, #tpu.memory_space<vmem>>, vector<32x96xbf16>
    %cst = arith.constant dense<0.000000e+00> : vector<16x96xf32>
    %4 = tpu.matmul %2, %3, %cst {dimension_numbers = #tpu.dot_dimension_numbers<[1], [0], [0], [1], [0, 0, 1, 1], [], []>} : vector<16x32xbf16>, vector<32x96xbf16>, vector<16x96xf32> -> vector<16x96xf32>
    %c0_4 = arith.constant 0 : index
    %c0_5 = arith.constant 0 : index
    %5 = vector.load %arg3[%c0_4, %c0_5] : memref<1x96xf32, #tpu.memory_space<vmem>>, vector<1x96xf32>
    %6 = vector.broadcast %5 : vector<1x96xf32> to vector<16x96xf32>
    %7 = arith.addf %4, %6 : vector<16x96xf32>
    %8 = arith.truncf %7 : vector<16x96xf32> to vector<16x96xbf16>
    %9 = vector.shape_cast %8 : vector<16x96xbf16> to vector<8x2x96xbf16>
    %10 = vector.extract_strided_slice %9 {offsets = [0, 0, 0], sizes = [8, 1, 96], strides = [1, 1, 1]} : vector<8x2x96xbf16> to vector<8x1x96xbf16>
    %11 = vector.shape_cast %10 : vector<8x1x96xbf16> to vector<8x96xbf16>
    %12 = vector.extract_strided_slice %11 {offsets = [0, 0], sizes = [8, 8], strides = [1, 1]} : vector<8x96xbf16> to vector<8x8xbf16>
    %13 = vector.extract_strided_slice %11 {offsets = [0, 8], sizes = [8, 8], strides = [1, 1]} : vector<8x96xbf16> to vector<8x8xbf16>
    %14 = vector.extract_strided_slice %11 {offsets = [0, 16], sizes = [8, 8], strides = [1, 1]} : vector<8x96xbf16> to vector<8x8xbf16>
    %15 = vector.extract_strided_slice %11 {offsets = [0, 24], sizes = [8, 8], strides = [1, 1]} : vector<8x96xbf16> to vector<8x8xbf16>
    %16 = vector.shape_cast %12 : vector<8x8xbf16> to vector<1x8x8xbf16>
    %17 = vector.shape_cast %13 : vector<8x8xbf16> to vector<1x8x8xbf16>
    %18 = vector.shape_cast %14 : vector<8x8xbf16> to vector<1x8x8xbf16>
    %19 = vector.shape_cast %15 : vector<8x8xbf16> to vector<1x8x8xbf16>
    %20 = tpu.concatenate %16, %17, %18, %19 in 0 : vector<1x8x8xbf16>, vector<1x8x8xbf16>, vector<1x8x8xbf16>, vector<1x8x8xbf16> -> vector<4x8x8xbf16>
    %21 = vector.extract_strided_slice %11 {offsets = [0, 32], sizes = [8, 8], strides = [1, 1]} : vector<8x96xbf16> to vector<8x8xbf16>
    %22 = vector.extract_strided_slice %11 {offsets = [0, 40], sizes = [8, 8], strides = [1, 1]} : vector<8x96xbf16> to vector<8x8xbf16>
    %23 = vector.extract_strided_slice %11 {offsets = [0, 48], sizes = [8, 8], strides = [1, 1]} : vector<8x96xbf16> to vector<8x8xbf16>
    %24 = vector.extract_strided_slice %11 {offsets = [0, 56], sizes = [8, 8], strides = [1, 1]} : vector<8x96xbf16> to vector<8x8xbf16>
    %25 = vector.shape_cast %21 : vector<8x8xbf16> to vector<1x8x8xbf16>
    %26 = vector.shape_cast %22 : vector<8x8xbf16> to vector<1x8x8xbf16>
    %27 = vector.shape_cast %23 : vector<8x8xbf16> to vector<1x8x8xbf16>
    %28 = vector.shape_cast %24 : vector<8x8xbf16> to vector<1x8x8xbf16>
    %29 = tpu.concatenate %25, %26, %27, %28 in 0 : vector<1x8x8xbf16>, vector<1x8x8xbf16>, vector<1x8x8xbf16>, vector<1x8x8xbf16> -> vector<4x8x8xbf16>
    %30 = vector.extract_strided_slice %11 {offsets = [0, 64], sizes = [8, 8], strides = [1, 1]} : vector<8x96xbf16> to vector<8x8xbf16>
    %31 = vector.extract_strided_slice %11 {offsets = [0, 72], sizes = [8, 8], strides = [1, 1]} : vector<8x96xbf16> to vector<8x8xbf16>
    %32 = vector.extract_strided_slice %11 {offsets = [0, 80], sizes = [8, 8], strides = [1, 1]} : vector<8x96xbf16> to vector<8x8xbf16>
    %33 = vector.extract_strided_slice %11 {offsets = [0, 88], sizes = [8, 8], strides = [1, 1]} : vector<8x96xbf16> to vector<8x8xbf16>
    %34 = vector.shape_cast %30 : vector<8x8xbf16> to vector<1x8x8xbf16>
    %35 = vector.shape_cast %31 : vector<8x8xbf16> to vector<1x8x8xbf16>
    %36 = vector.shape_cast %32 : vector<8x8xbf16> to vector<1x8x8xbf16>
    %37 = vector.shape_cast %33 : vector<8x8xbf16> to vector<1x8x8xbf16>
    %38 = tpu.concatenate %34, %35, %36, %37 in 0 : vector<1x8x8xbf16>, vector<1x8x8xbf16>, vector<1x8x8xbf16>, vector<1x8x8xbf16> -> vector<4x8x8xbf16>
    "tpu.trace_start"() <{level = 10 : i32, message = "hqd,hkd->hqk"}> : () -> ()
    %cst_6 = arith.constant dense<0.000000e+00> : vector<4x8x8xf32>
    %39 = tpu.matmul %20, %29, %cst_6 {dimension_numbers = #tpu.dot_dimension_numbers<[2], [2], [1], [1], [0, 0, 0, 1, 1, 1], [0], [0]>} : vector<4x8x8xbf16>, vector<4x8x8xbf16>, vector<4x8x8xf32> -> vector<4x8x8xf32>
    "tpu.trace_stop"() : () -> ()
    %cst_7 = arith.constant dense<0xFF800000> : vector<4x8xf32>
    %40 = vector.multi_reduction <maximumf>, %39, %cst_7 [2] : vector<4x8x8xf32> to vector<4x8xf32>
    %41 = vector.shape_cast %40 : vector<4x8xf32> to vector<4x8x1xf32>
    %42 = vector.broadcast %41 : vector<4x8x1xf32> to vector<4x8x8xf32>
    %43 = arith.subf %39, %42 : vector<4x8x8xf32>
    %44 = math.exp %43 : vector<4x8x8xf32>
    %cst_8 = arith.constant dense<0.000000e+00> : vector<4x8xf32>
    %45 = vector.multi_reduction <add>, %44, %cst_8 [2] : vector<4x8x8xf32> to vector<4x8xf32>
    %46 = vector.shape_cast %45 : vector<4x8xf32> to vector<4x8x1xf32>
    %47 = tpu.reciprocal %46 {approx = true} : vector<4x8x1xf32> -> vector<4x8x1xf32>
    %48 = vector.broadcast %47 : vector<4x8x1xf32> to vector<4x8x8xf32>
    %49 = arith.mulf %44, %48 : vector<4x8x8xf32>
    %50 = arith.truncf %49 : vector<4x8x8xf32> to vector<4x8x8xbf16>
    "tpu.trace_start"() <{level = 10 : i32, message = "hqk,hkd->hqd"}> : () -> ()
    %cst_9 = arith.constant dense<0.000000e+00> : vector<4x8x8xf32>
    %51 = tpu.matmul %50, %38, %cst_9 {dimension_numbers = #tpu.dot_dimension_numbers<[2], [1], [1], [2], [0, 0, 0, 1, 1, 2], [0], [0]>} : vector<4x8x8xbf16>, vector<4x8x8xbf16>, vector<4x8x8xf32> -> vector<4x8x8xf32>
    "tpu.trace_stop"() : () -> ()
    %52 = vector.extract_strided_slice %51 {offsets = [0, 0, 0], sizes = [1, 8, 8], strides = [1, 1, 1]} : vector<4x8x8xf32> to vector<1x8x8xf32>
    %53 = vector.shape_cast %52 : vector<1x8x8xf32> to vector<8x8xf32>
    %54 = vector.extract_strided_slice %51 {offsets = [1, 0, 0], sizes = [1, 8, 8], strides = [1, 1, 1]} : vector<4x8x8xf32> to vector<1x8x8xf32>
    %55 = vector.shape_cast %54 : vector<1x8x8xf32> to vector<8x8xf32>
    %56 = vector.extract_strided_slice %51 {offsets = [2, 0, 0], sizes = [1, 8, 8], strides = [1, 1, 1]} : vector<4x8x8xf32> to vector<1x8x8xf32>
    %57 = vector.shape_cast %56 : vector<1x8x8xf32> to vector<8x8xf32>
    %58 = vector.extract_strided_slice %51 {offsets = [3, 0, 0], sizes = [1, 8, 8], strides = [1, 1, 1]} : vector<4x8x8xf32> to vector<1x8x8xf32>
    %59 = vector.shape_cast %58 : vector<1x8x8xf32> to vector<8x8xf32>
    %60 = tpu.concatenate %53, %55, %57, %59 in 1 : vector<8x8xf32>, vector<8x8xf32>, vector<8x8xf32>, vector<8x8xf32> -> vector<8x32xf32>
    %61 = arith.truncf %60 : vector<8x32xf32> to vector<8x32xbf16>
    %62 = vector.extract_strided_slice %9 {offsets = [0, 1, 0], sizes = [8, 1, 96], strides = [1, 1, 1]} : vector<8x2x96xbf16> to vector<8x1x96xbf16>
    %63 = vector.shape_cast %62 : vector<8x1x96xbf16> to vector<8x96xbf16>
    %64 = vector.extract_strided_slice %63 {offsets = [0, 0], sizes = [8, 8], strides = [1, 1]} : vector<8x96xbf16> to vector<8x8xbf16>
    %65 = vector.extract_strided_slice %63 {offsets = [0, 8], sizes = [8, 8], strides = [1, 1]} : vector<8x96xbf16> to vector<8x8xbf16>
    %66 = vector.extract_strided_slice %63 {offsets = [0, 16], sizes = [8, 8], strides = [1, 1]} : vector<8x96xbf16> to vector<8x8xbf16>
    %67 = vector.extract_strided_slice %63 {offsets = [0, 24], sizes = [8, 8], strides = [1, 1]} : vector<8x96xbf16> to vector<8x8xbf16>
    %68 = vector.shape_cast %64 : vector<8x8xbf16> to vector<1x8x8xbf16>
    %69 = vector.shape_cast %65 : vector<8x8xbf16> to vector<1x8x8xbf16>
    %70 = vector.shape_cast %66 : vector<8x8xbf16> to vector<1x8x8xbf16>
    %71 = vector.shape_cast %67 : vector<8x8xbf16> to vector<1x8x8xbf16>
    %72 = tpu.concatenate %68, %69, %70, %71 in 0 : vector<1x8x8xbf16>, vector<1x8x8xbf16>, vector<1x8x8xbf16>, vector<1x8x8xbf16> -> vector<4x8x8xbf16>
    %73 = vector.extract_strided_slice %63 {offsets = [0, 32], sizes = [8, 8], strides = [1, 1]} : vector<8x96xbf16> to vector<8x8xbf16>
    %74 = vector.extract_strided_slice %63 {offsets = [0, 40], sizes = [8, 8], strides = [1, 1]} : vector<8x96xbf16> to vector<8x8xbf16>
    %75 = vector.extract_strided_slice %63 {offsets = [0, 48], sizes = [8, 8], strides = [1, 1]} : vector<8x96xbf16> to vector<8x8xbf16>
    %76 = vector.extract_strided_slice %63 {offsets = [0, 56], sizes = [8, 8], strides = [1, 1]} : vector<8x96xbf16> to vector<8x8xbf16>
    %77 = vector.shape_cast %73 : vector<8x8xbf16> to vector<1x8x8xbf16>
    %78 = vector.shape_cast %74 : vector<8x8xbf16> to vector<1x8x8xbf16>
    %79 = vector.shape_cast %75 : vector<8x8xbf16> to vector<1x8x8xbf16>
    %80 = vector.shape_cast %76 : vector<8x8xbf16> to vector<1x8x8xbf16>
    %81 = tpu.concatenate %77, %78, %79, %80 in 0 : vector<1x8x8xbf16>, vector<1x8x8xbf16>, vector<1x8x8xbf16>, vector<1x8x8xbf16> -> vector<4x8x8xbf16>
    %82 = vector.extract_strided_slice %63 {offsets = [0, 64], sizes = [8, 8], strides = [1, 1]} : vector<8x96xbf16> to vector<8x8xbf16>
    %83 = vector.extract_strided_slice %63 {offsets = [0, 72], sizes = [8, 8], strides = [1, 1]} : vector<8x96xbf16> to vector<8x8xbf16>
    %84 = vector.extract_strided_slice %63 {offsets = [0, 80], sizes = [8, 8], strides = [1, 1]} : vector<8x96xbf16> to vector<8x8xbf16>
    %85 = vector.extract_strided_slice %63 {offsets = [0, 88], sizes = [8, 8], strides = [1, 1]} : vector<8x96xbf16> to vector<8x8xbf16>
    %86 = vector.shape_cast %82 : vector<8x8xbf16> to vector<1x8x8xbf16>
    %87 = vector.shape_cast %83 : vector<8x8xbf16> to vector<1x8x8xbf16>
    %88 = vector.shape_cast %84 : vector<8x8xbf16> to vector<1x8x8xbf16>
    %89 = vector.shape_cast %85 : vector<8x8xbf16> to vector<1x8x8xbf16>
    %90 = tpu.concatenate %86, %87, %88, %89 in 0 : vector<1x8x8xbf16>, vector<1x8x8xbf16>, vector<1x8x8xbf16>, vector<1x8x8xbf16> -> vector<4x8x8xbf16>
    "tpu.trace_start"() <{level = 10 : i32, message = "hqd,hkd->hqk"}> : () -> ()
    %cst_10 = arith.constant dense<0.000000e+00> : vector<4x8x8xf32>
    %91 = tpu.matmul %72, %81, %cst_10 {dimension_numbers = #tpu.dot_dimension_numbers<[2], [2], [1], [1], [0, 0, 0, 1, 1, 1], [0], [0]>} : vector<4x8x8xbf16>, vector<4x8x8xbf16>, vector<4x8x8xf32> -> vector<4x8x8xf32>
    "tpu.trace_stop"() : () -> ()
    %cst_11 = arith.constant dense<0xFF800000> : vector<4x8xf32>
    %92 = vector.multi_reduction <maximumf>, %91, %cst_11 [2] : vector<4x8x8xf32> to vector<4x8xf32>
    %93 = vector.shape_cast %92 : vector<4x8xf32> to vector<4x8x1xf32>
    %94 = vector.broadcast %93 : vector<4x8x1xf32> to vector<4x8x8xf32>
    %95 = arith.subf %91, %94 : vector<4x8x8xf32>
    %96 = math.exp %95 : vector<4x8x8xf32>
    %cst_12 = arith.constant dense<0.000000e+00> : vector<4x8xf32>
    %97 = vector.multi_reduction <add>, %96, %cst_12 [2] : vector<4x8x8xf32> to vector<4x8xf32>
    %98 = vector.shape_cast %97 : vector<4x8xf32> to vector<4x8x1xf32>
    %99 = tpu.reciprocal %98 {approx = true} : vector<4x8x1xf32> -> vector<4x8x1xf32>
    %100 = vector.broadcast %99 : vector<4x8x1xf32> to vector<4x8x8xf32>
    %101 = arith.mulf %96, %100 : vector<4x8x8xf32>
    %102 = arith.truncf %101 : vector<4x8x8xf32> to vector<4x8x8xbf16>
    "tpu.trace_start"() <{level = 10 : i32, message = "hqk,hkd->hqd"}> : () -> ()
    %cst_13 = arith.constant dense<0.000000e+00> : vector<4x8x8xf32>
    %103 = tpu.matmul %102, %90, %cst_13 {dimension_numbers = #tpu.dot_dimension_numbers<[2], [1], [1], [2], [0, 0, 0, 1, 1, 2], [0], [0]>} : vector<4x8x8xbf16>, vector<4x8x8xbf16>, vector<4x8x8xf32> -> vector<4x8x8xf32>
    "tpu.trace_stop"() : () -> ()
    %104 = vector.extract_strided_slice %103 {offsets = [0, 0, 0], sizes = [1, 8, 8], strides = [1, 1, 1]} : vector<4x8x8xf32> to vector<1x8x8xf32>
    %105 = vector.shape_cast %104 : vector<1x8x8xf32> to vector<8x8xf32>
    %106 = vector.extract_strided_slice %103 {offsets = [1, 0, 0], sizes = [1, 8, 8], strides = [1, 1, 1]} : vector<4x8x8xf32> to vector<1x8x8xf32>
    %107 = vector.shape_cast %106 : vector<1x8x8xf32> to vector<8x8xf32>
    %108 = vector.extract_strided_slice %103 {offsets = [2, 0, 0], sizes = [1, 8, 8], strides = [1, 1, 1]} : vector<4x8x8xf32> to vector<1x8x8xf32>
    %109 = vector.shape_cast %108 : vector<1x8x8xf32> to vector<8x8xf32>
    %110 = vector.extract_strided_slice %103 {offsets = [3, 0, 0], sizes = [1, 8, 8], strides = [1, 1, 1]} : vector<4x8x8xf32> to vector<1x8x8xf32>
    %111 = vector.shape_cast %110 : vector<1x8x8xf32> to vector<8x8xf32>
    %112 = tpu.concatenate %105, %107, %109, %111 in 1 : vector<8x8xf32>, vector<8x8xf32>, vector<8x8xf32>, vector<8x8xf32> -> vector<8x32xf32>
    %113 = arith.truncf %112 : vector<8x32xf32> to vector<8x32xbf16>
    %114 = vector.shape_cast %61 : vector<8x32xbf16> to vector<8x1x32xbf16>
    %115 = vector.shape_cast %113 : vector<8x32xbf16> to vector<8x1x32xbf16>
    %116 = tpu.concatenate %114, %115 in 1 : vector<8x1x32xbf16>, vector<8x1x32xbf16> -> vector<8x2x32xbf16>
    %117 = vector.shape_cast %116 : vector<8x2x32xbf16> to vector<16x32xbf16>
    %c0_14 = arith.constant 0 : index
    %c0_15 = arith.constant 0 : index
    %118 = vector.load %arg4[%c0_14, %c0_15] : memref<32x32xbf16, #tpu.memory_space<vmem>>, vector<32x32xbf16>
    %cst_16 = arith.constant dense<0.000000e+00> : vector<16x32xf32>
    %119 = tpu.matmul %117, %118, %cst_16 {dimension_numbers = #tpu.dot_dimension_numbers<[1], [0], [0], [1], [0, 0, 1, 1], [], []>} : vector<16x32xbf16>, vector<32x32xbf16>, vector<16x32xf32> -> vector<16x32xf32>
    %c0_17 = arith.constant 0 : index
    %c0_18 = arith.constant 0 : index
    %120 = vector.load %arg5[%c0_17, %c0_18] : memref<1x32xf32, #tpu.memory_space<vmem>>, vector<1x32xf32>
    %121 = vector.broadcast %120 : vector<1x32xf32> to vector<16x32xf32>
    %122 = arith.addf %119, %121 : vector<16x32xf32>
    %123 = arith.addf %1, %122 : vector<16x32xf32>
    %cst_19 = arith.constant dense<0.000000e+00> : vector<16xf32>
    %124 = vector.multi_reduction <add>, %123, %cst_19 [1] : vector<16x32xf32> to vector<16xf32>
    %125 = vector.shape_cast %124 : vector<16xf32> to vector<16x1xf32>
    %cst_20 = arith.constant 3.200000e+01 : f32
    %126 = vector.broadcast %cst_20 : f32 to vector<16x1xf32>
    %127 = arith.divf %125, %126 : vector<16x1xf32>
    %128 = vector.broadcast %127 : vector<16x1xf32> to vector<16x32xf32>
    %129 = arith.subf %123, %128 : vector<16x32xf32>
    %130 = arith.mulf %129, %129 : vector<16x32xf32>
    %cst_21 = arith.constant dense<0.000000e+00> : vector<16xf32>
    %131 = vector.multi_reduction <add>, %130, %cst_21 [1] : vector<16x32xf32> to vector<16xf32>
    %132 = vector.shape_cast %131 : vector<16xf32> to vector<16x1xf32>
    %cst_22 = arith.constant 3.200000e+01 : f32
    %133 = vector.broadcast %cst_22 : f32 to vector<16x1xf32>
    %134 = arith.divf %132, %133 : vector<16x1xf32>
    %135 = vector.broadcast %127 : vector<16x1xf32> to vector<16x32xf32>
    %136 = arith.subf %123, %135 : vector<16x32xf32>
    %cst_23 = arith.constant 9.99999974E-6 : f32
    %137 = vector.broadcast %cst_23 : f32 to vector<16x1xf32>
    %138 = arith.addf %134, %137 : vector<16x1xf32>
    %139 = math.rsqrt %138 : vector<16x1xf32>
    %140 = vector.broadcast %139 : vector<16x1xf32> to vector<16x32xf32>
    %141 = arith.mulf %136, %140 : vector<16x32xf32>
    %c0_24 = arith.constant 0 : index
    %c0_25 = arith.constant 0 : index
    %142 = vector.load %arg10[%c0_24, %c0_25] : memref<1x32xf32, #tpu.memory_space<vmem>>, vector<1x32xf32>
    %143 = vector.broadcast %142 : vector<1x32xf32> to vector<16x32xf32>
    %144 = arith.mulf %141, %143 : vector<16x32xf32>
    %c0_26 = arith.constant 0 : index
    %c0_27 = arith.constant 0 : index
    %145 = vector.load %arg11[%c0_26, %c0_27] : memref<1x32xf32, #tpu.memory_space<vmem>>, vector<1x32xf32>
    %146 = vector.broadcast %145 : vector<1x32xf32> to vector<16x32xf32>
    %147 = arith.addf %144, %146 : vector<16x32xf32>
    %148 = arith.truncf %147 : vector<16x32xf32> to vector<16x32xbf16>
    %c0_28 = arith.constant 0 : index
    %c0_29 = arith.constant 0 : index
    %149 = vector.load %arg6[%c0_28, %c0_29] : memref<32x64xbf16, #tpu.memory_space<vmem>>, vector<32x64xbf16>
    %cst_30 = arith.constant dense<0.000000e+00> : vector<16x64xf32>
    %150 = tpu.matmul %148, %149, %cst_30 {dimension_numbers = #tpu.dot_dimension_numbers<[1], [0], [0], [1], [0, 0, 1, 1], [], []>} : vector<16x32xbf16>, vector<32x64xbf16>, vector<16x64xf32> -> vector<16x64xf32>
    %c0_31 = arith.constant 0 : index
    %c0_32 = arith.constant 0 : index
    %151 = vector.load %arg7[%c0_31, %c0_32] : memref<1x64xf32, #tpu.memory_space<vmem>>, vector<1x64xf32>
    %152 = vector.broadcast %151 : vector<1x64xf32> to vector<16x64xf32>
    %153 = arith.addf %150, %152 : vector<16x64xf32>
    %cst_33 = arith.constant 0.000000e+00 : f32
    %154 = vector.broadcast %cst_33 : f32 to vector<16x64xf32>
    %155 = arith.maximumf %153, %154 : vector<16x64xf32>
    %156 = arith.truncf %155 : vector<16x64xf32> to vector<16x64xbf16>
    %c0_34 = arith.constant 0 : index
    %c0_35 = arith.constant 0 : index
    %157 = vector.load %arg8[%c0_34, %c0_35] : memref<64x32xbf16, #tpu.memory_space<vmem>>, vector<64x32xbf16>
    %cst_36 = arith.constant dense<0.000000e+00> : vector<16x32xf32>
    %158 = tpu.matmul %156, %157, %cst_36 {dimension_numbers = #tpu.dot_dimension_numbers<[1], [0], [0], [1], [0, 0, 1, 1], [], []>} : vector<16x64xbf16>, vector<64x32xbf16>, vector<16x32xf32> -> vector<16x32xf32>
    %c0_37 = arith.constant 0 : index
    %c0_38 = arith.constant 0 : index
    %159 = vector.load %arg9[%c0_37, %c0_38] : memref<1x32xf32, #tpu.memory_space<vmem>>, vector<1x32xf32>
    %160 = vector.broadcast %159 : vector<1x32xf32> to vector<16x32xf32>
    %161 = arith.addf %158, %160 : vector<16x32xf32>
    %162 = arith.addf %147, %161 : vector<16x32xf32>
    %cst_39 = arith.constant dense<0.000000e+00> : vector<16xf32>
    %163 = vector.multi_reduction <add>, %162, %cst_39 [1] : vector<16x32xf32> to vector<16xf32>
    %164 = vector.shape_cast %163 : vector<16xf32> to vector<16x1xf32>
    %cst_40 = arith.constant 3.200000e+01 : f32
    %165 = vector.broadcast %cst_40 : f32 to vector<16x1xf32>
    %166 = arith.divf %164, %165 : vector<16x1xf32>
    %167 = vector.broadcast %166 : vector<16x1xf32> to vector<16x32xf32>
    %168 = arith.subf %162, %167 : vector<16x32xf32>
    %169 = arith.mulf %168, %168 : vector<16x32xf32>
    %cst_41 = arith.constant dense<0.000000e+00> : vector<16xf32>
    %170 = vector.multi_reduction <add>, %169, %cst_41 [1] : vector<16x32xf32> to vector<16xf32>
    %171 = vector.shape_cast %170 : vector<16xf32> to vector<16x1xf32>
    %cst_42 = arith.constant 3.200000e+01 : f32
    %172 = vector.broadcast %cst_42 : f32 to vector<16x1xf32>
    %173 = arith.divf %171, %172 : vector<16x1xf32>
    %174 = vector.broadcast %166 : vector<16x1xf32> to vector<16x32xf32>
    %175 = arith.subf %162, %174 : vector<16x32xf32>
    %cst_43 = arith.constant 9.99999974E-6 : f32
    %176 = vector.broadcast %cst_43 : f32 to vector<16x1xf32>
    %177 = arith.addf %173, %176 : vector<16x1xf32>
    %178 = math.rsqrt %177 : vector<16x1xf32>
    %179 = vector.broadcast %178 : vector<16x1xf32> to vector<16x32xf32>
    %180 = arith.mulf %175, %179 : vector<16x32xf32>
    %c0_44 = arith.constant 0 : index
    %c0_45 = arith.constant 0 : index
    %181 = vector.load %arg12[%c0_44, %c0_45] : memref<1x32xf32, #tpu.memory_space<vmem>>, vector<1x32xf32>
    %182 = vector.broadcast %181 : vector<1x32xf32> to vector<16x32xf32>
    %183 = arith.mulf %180, %182 : vector<16x32xf32>
    %c0_46 = arith.constant 0 : index
    %c0_47 = arith.constant 0 : index
    %184 = vector.load %arg13[%c0_46, %c0_47] : memref<1x32xf32, #tpu.memory_space<vmem>>, vector<1x32xf32>
    %185 = vector.broadcast %184 : vector<1x32xf32> to vector<16x32xf32>
    %186 = arith.addf %183, %185 : vector<16x32xf32>
    %187 = vector.shape_cast %186 : vector<16x32xf32> to vector<8x2x32xf32>
    %c0_48 = arith.constant 0 : index
    %c0_49 = arith.constant 0 : index
    %c0_50 = arith.constant 0 : index
    %188 = vector.load %arg14[%c0_48, %c0_49, %c0_50] : memref<8x2x32xf32, #tpu.memory_space<vmem>>, vector<8x2x32xf32>
    tpu.vector_store %arg14[%c0_48, %c0_49, %c0_50], %187 {strides = array<i32>} : memref<8x2x32xf32, #tpu.memory_space<vmem>>, vector<8x2x32xf32>,
    return
  }
  func.func @transform_0(%arg0: i32) -> (i32, i32, i32) {
    %c0_i32 = arith.constant 0 : i32
    %c0_i32_0 = arith.constant 0 : i32
    %c0_i32_1 = arith.constant 0 : i32
    return %c0_i32, %arg0, %c0_i32_0 : i32, i32, i32
  }
  func.func @transform_1(%arg0: i32) -> (i32, i32) {
    %c0_i32 = arith.constant 0 : i32
    %c0_i32_0 = arith.constant 0 : i32
    %c0_i32_1 = arith.constant 0 : i32
    return %c0_i32, %c0_i32_0 : i32, i32
  }
  func.func @transform_2(%arg0: i32) -> (i32, i32) {
    %c0_i32 = arith.constant 0 : i32
    %c0_i32_0 = arith.constant 0 : i32
    %c0_i32_1 = arith.constant 0 : i32
    return %c0_i32, %c0_i32_0 : i32, i32
  }
  func.func @transform_3(%arg0: i32) -> (i32, i32) {
    %c0_i32 = arith.constant 0 : i32
    %c0_i32_0 = arith.constant 0 : i32
    %c0_i32_1 = arith.constant 0 : i32
    return %c0_i32, %c0_i32_0 : i32, i32
  }
  func.func @transform_4(%arg0: i32) -> (i32, i32) {
    %c0_i32 = arith.constant 0 : i32
    %c0_i32_0 = arith.constant 0 : i32
    %c0_i32_1 = arith.constant 0 : i32
    return %c0_i32, %c0_i32_0 : i32, i32
  }
  func.func @transform_5(%arg0: i32) -> (i32, i32) {
    %c0_i32 = arith.constant 0 : i32
    %c0_i32_0 = arith.constant 0 : i32
    %c0_i32_1 = arith.constant 0 : i32
    return %c0_i32, %c0_i32_0 : i32, i32
  }
  func.func @transform_6(%arg0: i32) -> (i32, i32) {
    %c0_i32 = arith.constant 0 : i32
    %c0_i32_0 = arith.constant 0 : i32
    %c0_i32_1 = arith.constant 0 : i32
    return %c0_i32, %c0_i32_0 : i32, i32
  }
  func.func @transform_7(%arg0: i32) -> (i32, i32) {
    %c0_i32 = arith.constant 0 : i32
    %c0_i32_0 = arith.constant 0 : i32
    %c0_i32_1 = arith.constant 0 : i32
    return %c0_i32, %c0_i32_0 : i32, i32
  }
  func.func @transform_8(%arg0: i32) -> (i32, i32) {
    %c0_i32 = arith.constant 0 : i32
    %c0_i32_0 = arith.constant 0 : i32
    %c0_i32_1 = arith.constant 0 : i32
    return %c0_i32, %c0_i32_0 : i32, i32
  }
  func.func @transform_9(%arg0: i32) -> (i32, i32) {
    %c0_i32 = arith.constant 0 : i32
    %c0_i32_0 = arith.constant 0 : i32
    %c0_i32_1 = arith.constant 0 : i32
    return %c0_i32, %c0_i32_0 : i32, i32
  }
  func.func @transform_10(%arg0: i32) -> (i32, i32) {
    %c0_i32 = arith.constant 0 : i32
    %c0_i32_0 = arith.constant 0 : i32
    %c0_i32_1 = arith.constant 0 : i32
    return %c0_i32, %c0_i32_0 : i32, i32
  }
  func.func @transform_11(%arg0: i32) -> (i32, i32) {
    %c0_i32 = arith.constant 0 : i32
    %c0_i32_0 = arith.constant 0 : i32
    %c0_i32_1 = arith.constant 0 : i32
    return %c0_i32, %c0_i32_0 : i32, i32
  }
  func.func @transform_12(%arg0: i32) -> (i32, i32) {
    %c0_i32 = arith.constant 0 : i32
    %c0_i32_0 = arith.constant 0 : i32
    %c0_i32_1 = arith.constant 0 : i32
    return %c0_i32, %c0_i32_0 : i32, i32
  }
  func.func @transform_13(%arg0: i32) -> (i32, i32, i32) {
    %c0_i32 = arith.constant 0 : i32
    %c0_i32_0 = arith.constant 0 : i32
    %c0_i32_1 = arith.constant 0 : i32
    return %c0_i32, %arg0, %c0_i32_0 : i32, i32, i32
  }
}

</mosaic_0001>

<bundles_post_ra>
// kernel: _layer_impl.1
= control target key start
LH: loop header
LB: loop body
LE: loop exit
PB: predicated region body
PF: predicated region fallthrough
CT: control target
= control target key end

     0   :  { %18 = vsyncpa [#allocation3], 0  ;;  %s4511_s0 = inlined_call_operand.vmem [shape: f32[8,2,32], index: 0, kind: input, shape index: {}]   ;;  %s4512_s1 = inlined_call_operand.vmem [shape: bf16[32,96], index: 1, kind: input, shape index: {}]   ;;  %s4513_s2 = inlined_call_operand.vmem [shape: f32[1,96], index: 2, kind: input, shape index: {}]   ;;  %s4514_s3 = inlined_call_operand.vmem [shape: bf16[32,32], index: 3, kind: input, shape index: {}]   ;;  %s4515_s4 = inlined_call_operand.vmem [shape: f32[1,32], index: 4, kind: input, shape index: {}]   ;;  %s4516_s5 = inlined_call_operand.vmem [shape: bf16[32,64], index: 5, kind: input, shape index: {}]   ;;  %s4517_s6 = inlined_call_operand.hbm [shape: f32[1,64], index: 6, kind: input, shape index: {}]   ;;  %s4518_s7 = inlined_call_operand.vmem [shape: bf16[64,32], index: 7, kind: input, shape index: {}]   ;;  %s4519_s8 = inlined_call_operand.hbm [shape: f32[1,32], index: 8, kind: input, shape index: {}]   ;;  %s4520_s9 = inlined_call_operand.hbm [shape: f32[1,32], index: 9, kind: input, shape index: {}]   ;;  %s4521_s10 = inlined_call_operand.hbm [shape: f32[1,32], index: 10, kind: input, shape index: {}]   ;;  %s4522_s11 = inlined_call_operand.hbm [shape: f32[1,32], index: 11, kind: input, shape index: {}]   ;;  %s4523_s12 = inlined_call_operand.hbm [shape: f32[1,32], index: 12, kind: input, shape index: {}]   ;;  %s4524_s13 = inlined_call_operand.hbm [shape: f32[8,2,32], index: 13, kind: output, shape index: {}]  }
   0x1   :  { %19 = vsyncpa [#allocation6], 0 }
   0x2   :  { %20 = vsyncpa [#allocation9], 0 }
   0x3   :  { %21 = vsyncpa [#allocation12], 0 }
   0x4   :  { %22 = vsyncpa [#allocation4], 0  ;;  %s3628_s25 = smov [#allocation5]   ;;  %s3629_s27 = smov [#allocation8]  }
   0x5   :  { %s53_s26 = sshll.u32 %s3628_s25, 4  ;;  %s73_s28 = sshll.u32 %s3629_s27, 4  ;;  %s54_s26 = int_to_ptr.vmem [resolvable:$true] %s53_s26  ;;  %s74_s28 = int_to_ptr.vmem [resolvable:$true] %s73_s28 }
   0x6   :  { %s3464_s14 = scalar_lea.hbm %s4519_s8, 16 }
   0x7   :  { %p3465_p0 = scmp.ne.s32.totalorder %s4519_s8, %s3464_s14  ;;  %p3468_p1 = scmp.lt.u32.totalorder %s3464_s14, %s4519_s8 }
   0x9   :  { %p3470_p2 = pnand %p3468_p1, %p3465_p0 }
   0xb   :  { %3473 = shalt.err (!%p3470_p2)
}
   0xc   :  { %s3474_s19 = scalar_lea.vmem %s54_s26, 16  ;;  %s3478_s20 = scalar_lea.vmem %s54_s26, 32 }
   0xd   :  { %p3475_p3 = scmp.ne.s32.totalorder %s54_s26, %s3474_s19  ;;  %p3479_p4 = scmp.lt.s32.totalorder %s54_s26, %s54_s26 }
   0xe   :  { %p3480_p5 = scmp.lt.s32.totalorder %s3478_s20, %s3474_s19 }
  0x10   :  { %p3481_p6 = por %p3480_p5, %p3479_p4 }
  0x12   :  { %p3482_p7 = pnand %p3481_p6, %p3475_p3 }
  0x14   :  { %3485 = shalt.err (!%p3482_p7)
}
  0x15   :  { %56 = dma.hbm_to_vmem [thread:$0]  %s4519_s8, 16, %s54_s26, [#allocation6]  }
  0x16   :  { %s3486_s25 = scalar_lea.hbm %s4521_s10, 16 }
  0x17   :  { %p3487_p8 = scmp.ne.s32.totalorder %s4521_s10, %s3486_s25  ;;  %p3490_p9 = scmp.lt.u32.totalorder %s3486_s25, %s4521_s10 }
  0x19   :  { %p3492_p10 = pnand %p3490_p9, %p3487_p8 }
  0x1b   :  { %3495 = shalt.err (!%p3492_p10)
}
  0x1c   :  { %s3496_s15 = scalar_lea.vmem %s74_s28, 16  ;;  %s3500_s16 = scalar_lea.vmem %s74_s28, 32 }
  0x1d   :  { %p3497_p11 = scmp.ne.s32.totalorder %s74_s28, %s3496_s15  ;;  %p3501_p12 = scmp.lt.s32.totalorder %s74_s28, %s74_s28 }
  0x1e   :  { %p3502_p13 = scmp.lt.s32.totalorder %s3500_s16, %s3496_s15 }
  0x20   :  { %p3503_p0 = por %p3502_p13, %p3501_p12 }
  0x22   :  { %p3504_p1 = pnand %p3503_p0, %p3497_p11 }
  0x24   :  { %3507 = shalt.err (!%p3504_p1)
}
  0x25   :  { %76 = dma.hbm_to_vmem [thread:$0]  %s4521_s10, 16, %s74_s28, [#allocation9]  }
  0x26   :  { %s3630_s17 = smov [#allocation2]   ;;  %s3631_s19 = smov [#allocation7]  }
  0x27   :  { %s41_s18 = sshll.u32 %s3630_s17, 4  ;;  %s63_s20 = sshll.u32 %s3631_s19, 4  ;;  %s42_s18 = int_to_ptr.vmem [resolvable:$true] %s41_s18  ;;  %s64_s20 = int_to_ptr.vmem [resolvable:$true] %s63_s20 }
  0x28   :  { %s3508_s23 = scalar_lea.hbm %s4517_s6, 16 }
  0x29   :  { %p3509_p2 = scmp.ne.s32.totalorder %s4517_s6, %s3508_s23  ;;  %p3512_p3 = scmp.lt.u32.totalorder %s3508_s23, %s4517_s6 }
  0x2b   :  { %p3514_p4 = pnand %p3512_p3, %p3509_p2 }
  0x2d   :  { %3517 = shalt.err (!%p3514_p4)
}
  0x2e   :  { %s3518_s10 = scalar_lea.vmem %s42_s18, 16  ;;  %s3522_s28 = scalar_lea.vmem %s42_s18, 32 }
  0x2f   :  { %p3519_p5 = scmp.ne.s32.totalorder %s42_s18, %s3518_s10  ;;  %p3523_p6 = scmp.lt.s32.totalorder %s42_s18, %s42_s18 }
  0x30   :  { %p3524_p7 = scmp.lt.s32.totalorder %s3522_s28, %s3518_s10 }
  0x32   :  { %p3525_p8 = por %p3524_p7, %p3523_p6 }
  0x34   :  { %p3526_p9 = pnand %p3525_p8, %p3519_p5 }
  0x36   :  { %3529 = shalt.err (!%p3526_p9)
}
  0x37   :  { %44 = dma.hbm_to_vmem [thread:$0]  %s4517_s6, 16, %s42_s18, [#allocation3]  }
  0x38   :  { %s3530_s8 = scalar_lea.hbm %s4520_s9, 16 }
  0x39   :  { %p3531_p10 = scmp.ne.s32.totalorder %s4520_s9, %s3530_s8  ;;  %p3534_p11 = scmp.lt.u32.totalorder %s3530_s8, %s4520_s9 }
  0x3b   :  { %p3536_p12 = pnand %p3534_p11, %p3531_p10 }
  0x3d   :  { %3539 = shalt.err (!%p3536_p12)
}
  0x3e   :  { %s3540_s22 = scalar_lea.vmem %s64_s20, 16  ;;  %s3544_s23 = scalar_lea.vmem %s64_s20, 32 }
  0x3f   :  { %p3541_p13 = scmp.ne.s32.totalorder %s64_s20, %s3540_s22  ;;  %p3545_p0 = scmp.lt.s32.totalorder %s64_s20, %s64_s20 }
  0x40   :  { %p3546_p1 = scmp.lt.s32.totalorder %s3544_s23, %s3540_s22 }
  0x42   :  { %p3547_p2 = por %p3546_p1, %p3545_p0 }
  0x44   :  { %p3548_p3 = pnand %p3547_p2, %p3541_p13 }
  0x46   :  { %3551 = shalt.err (!%p3548_p3)
}
  0x47   :  { %66 = dma.hbm_to_vmem [thread:$0]  %s4520_s9, 16, %s64_s20, [#allocation6]  }
  0x48   :  { %s3632_s24 = smov [#allocation10]   ;;  %s3633_s27 = smov [#allocation11]  }
  0x49   :  { %s83_s25 = sshll.u32 %s3632_s24, 4  ;;  %s93_s29 = sshll.u32 %s3633_s27, 4  ;;  %s84_s25 = int_to_ptr.vmem [resolvable:$true] %s83_s25  ;;  %s94_s29 = int_to_ptr.vmem [resolvable:$true] %s93_s29 }
  0x4a   :  { %s3552_s30 = scalar_lea.hbm %s4522_s11, 16 }
  0x4b   :  { %p3553_p4 = scmp.ne.s32.totalorder %s4522_s11, %s3552_s30  ;;  %p3556_p5 = scmp.lt.u32.totalorder %s3552_s30, %s4522_s11 }
  0x4d   :  { %p3558_p6 = pnand %p3556_p5, %p3553_p4 }
  0x4f   :  { %3561 = shalt.err (!%p3558_p6)
}
  0x50   :  { %s3562_s9 = scalar_lea.vmem %s84_s25, 16  ;;  %s3566_s20 = scalar_lea.vmem %s84_s25, 32 }
  0x51   :  { %p3563_p7 = scmp.ne.s32.totalorder %s84_s25, %s3562_s9  ;;  %p3567_p8 = scmp.lt.s32.totalorder %s84_s25, %s84_s25 }
  0x52   :  { %p3568_p9 = scmp.lt.s32.totalorder %s3566_s20, %s3562_s9 }
  0x54   :  { %p3569_p10 = por %p3568_p9, %p3567_p8 }
  0x56   :  { %p3570_p11 = pnand %p3569_p10, %p3563_p7 }
  0x58   :  { %3573 = shalt.err (!%p3570_p11)
}
  0x59   :  { %86 = dma.hbm_to_vmem [thread:$0]  %s4522_s11, 16, %s84_s25, [#allocation9]  }
  0x5a   :  { %s3574_s22 = scalar_lea.hbm %s4523_s12, 16 }
  0x5b   :  { %p3575_p12 = scmp.ne.s32.totalorder %s4523_s12, %s3574_s22  ;;  %p3578_p13 = scmp.lt.u32.totalorder %s3574_s22, %s4523_s12 }
  0x5d   :  { %p3580_p0 = pnand %p3578_p13, %p3575_p12 }
  0x5f   :  { %3583 = shalt.err (!%p3580_p0)
}
  0x60   :  { %s3584_s27 = scalar_lea.vmem %s94_s29, 16  ;;  %s3588_s10 = scalar_lea.vmem %s94_s29, 32 }
  0x61   :  { %p3585_p1 = scmp.ne.s32.totalorder %s94_s29, %s3584_s27  ;;  %p3589_p2 = scmp.lt.s32.totalorder %s94_s29, %s94_s29 }
  0x62   :  { %p3590_p3 = scmp.lt.s32.totalorder %s3588_s10, %s3584_s27 }
  0x64   :  { %p3591_p4 = por %p3590_p3, %p3589_p2 }
  0x66   :  { %p3592_p5 = pnand %p3591_p4, %p3585_p1 }
  0x68   :  { %3595 = shalt.err (!%p3592_p5)
}
  0x69   :  { %96 = dma.hbm_to_vmem [thread:$0]  %s4523_s12, 16, %s94_s29, [#allocation12]  }
  0x6a   :  { %3618 = dma.done.wait [#allocation3], 16  }
  0x6b   :  { %3619 = vsyncadd [#allocation3], 4294967280 }
  0x6c   :  { %3620 = dma.done.wait [#allocation6], 32  }
  0x6d   :  { %3621 = vsyncadd [#allocation6], 4294967264 }
  0x6e   :  { %3622 = dma.done.wait [#allocation9], 32  }
  0x6f   :  { %3623 = vsyncadd [#allocation9], 4294967264 }
  0x70   :  { %3624 = dma.done.wait [#allocation12], 16  }
  0x71   :  { %3625 = vsyncadd [#allocation12], 4294967280  ;;  %v137_v0 = vlaneseq  ;;  %v3634_v1 = vmov 0.0   ;;  %vm3635_vm0 = vmmov 0   ;;  %v3636_v2 = vmov 1983009808  }
  0x72   :  { %3234 = vmatprep.subr.bf16.mxu0 %v3634_v1  ;;  %3238 = vmatprep.mubr.msk.bf16.mxu0 %vm3635_vm0, %v3634_v1  ;;  %v135_v3 = vunpack.c.l.s4 %v3636_v2  ;;  %v3406_v6 = vld [vmem:[%s4512_s1] sm:$0xff]   ;;  %v3407_v7 = vld [vmem:[%s4512_s1 + $0x8] sm:$0xff]   ;;  %vm192_vm1 = vcmask 261120   ;;  %v3637_v28 = vmov 1966171168   ;;  %vm457_vm2 = vcmask 1041409  }
  0x73   :  { %3242 = vmatprep.subr.bf16.mxu1 %v3634_v1  ;;  %3244 = vmatprep.mubr.msk.bf16.mxu1 %vm3635_vm0, %v3634_v1  ;;  %v3801_v5 = vshrl.u32 %v137_v0, 7  ;;  %v116_v9 = vld [vmem:[%s4511_s0] sm:$0x3]  ;;  %v117_v10 = vld [vmem:[%s4511_s0 + $0x2] sm:$0x3]  ;;  %v241_v29 = vunpack.c.l.s4 %v3637_v28  ;;  %vm460_vm3 = vcmask 1042434  }
  0x74   :  { %v136_v4 = vunpack.c.0.s8 %v135_v3  ;;  %3235 = vmatpush3.bf16.msra.mxu0 %v3406_v6  ;;  %v118_v11 = vld [vmem:[%s4511_s0 + $0x4] sm:$0x3]  ;;  %v119_v12 = vld [vmem:[%s4511_s0 + $0x6] sm:$0x3]  ;;  %v120_v13 = vld [vmem:[%s4511_s0 + $0x8] sm:$0x3]  ;;  %v132_v15 = vcombine.low %v116_v9, %v117_v10 }
  0x75   :  { %3236 = vmatprep.subr.bf16.mxu0 %v3634_v1  ;;  %v121_v14 = vld [vmem:[%s4511_s0 + $0xa] sm:$0x3]  ;;  %v122_v16 = vld [vmem:[%s4511_s0 + $0xc] sm:$0x3]  ;;  %v123_v17 = vld [vmem:[%s4511_s0 + $0xe] sm:$0x3]  ;;  %v133_v18 = vcombine.low %v118_v11, %v119_v12  ;;  %v242_v30 = vunpack.c.0.s8 %v241_v29 }
  0x76   :  { %v3810_v8 = vsub.s32 %v136_v4, %v3801_v5  ;;  %v149_v19 = vcombine.low %v120_v13, %v121_v14  ;;  %v150_v21 = vcombine.low %v122_v16, %v123_v17  ;;  %v3141_v31 = vld [vmem:[%s4513_s2] ss:$0 sm:$0xff]  ;;  %s3638_s2 = smov 120   ;;  %vm463_vm4 = vcmask 1043459   ;;  %s3639_s11 = smov 112  }
  0x77   :  { %v3849_v35 = vsub.s32 %v242_v30, %v3801_v5  ;;  %vm466_vm5 = vcmask 1044484   ;;  %vm469_vm6 = vcmask 1045509   ;;  %vm472_vm7 = vcmask 1046534   ;;  %s3640_s25 = smov 104   ;;  %s3641_s12 = smov 96  }
  0x78   :  { %v140_v20 = vrot.slane %v132_v15, %v3810_v8  ;;  %3237 = vmatpush3.bf16.msra.mxu0 %v3407_v7  ;;  %v147_v22 = vrot.slane %v133_v18, %v3810_v8  ;;  %v157_v23 = vrot.slane %v149_v19, %v3810_v8  ;;  %v164_v24 = vrot.slane %v150_v21, %v3810_v8  ;;  %s3642_s29 = smov 64   ;;  %s3643_s28 = smov 16  }
  0x79   :  { %3248 = vmatprep.subr.bf16.mxu0 %v3634_v1  ;;  %vm475_vm8 = vcmask 1047559   ;;  %vm480_vm9 = vcmask 64512   ;;  %vm1129_vm10 = vcmask 1043456   ;;  %s3644_s30 = smov 8   ;;  %s3645_s14 = smov 24   ;;  %vm1330_vm11 = vcmask 130048  }
  0x7a   :  { %v148_v25 = vcombine.low %v140_v20, %v147_v22  ;;  %v165_v26 = vcombine.low %v157_v23, %v164_v24  ;;  %vm1332_vm12 = vcmask 195584   ;;  %vm2005_vm13 = vcmask 1040384  }
  0x7b   :  { %vm2006_vm14 = vsmask.f32 256 }
  0x7c   :  { %v168_v27 = vpack.c.bf16 %v165_v26, %v148_v25  ;;  %vm4284_vm15 = vmand %vm2005_vm13, %vm2006_vm14 }
  0x7e   :  { %3239 = vmatmul.mubr.msk.bf16.vlgmr.msra.gmra.mrb[0].mxu0 %vm192_vm1, %v168_v27 }
  0x7f   :  { %3250 = vmatprep.mubr.msk.bf16.mxu0 %vm3635_vm0, %v3634_v1 }
 0x151   :  { %v230_v32 = vpop.f32.mrb[0].mxu0 }
 0x152   :  { %v3240_v33 = vpop.f32.mrb[1].mxu0  ;;  %v231_v36 = vadd.f32 %v3141_v31, %v230_v32 }
 0x153   :  { %v233_v34 = vpop.f32.mrb[2].mxu0 }
 0x154   :  { %v234_v37 = vadd.f32 %v3141_v31, %v233_v34  ;;  %v3241_v38 = vpop.f32.mrb[3].mxu0 }
 0x156   :  { %v237_v39 = vpack.c.bf16 %v234_v37, %v231_v36  ;;  %v3145_v40 = vpack.c.bf16 %v234_v37, %v234_v37 }
 0x158   :  { %v246_v41 = vrot.slane %v237_v39, %v3849_v35  ;;  %v253_v42 = vrot.slane %v3145_v40, %v3849_v35 }
 0x15a   :  { %v254_v43 = vcombine.high %v246_v41, %v246_v41  ;;  %v255_v44 = vcombine.high %v253_v42, %v253_v42  ;;  %v262_v45 = vrot.slane %v246_v41, %v3849_v35  ;;  %v269_v46 = vrot.slane %v253_v42, %v3849_v35 }
 0x15c   :  { %v3856_v47 = vrot.slane %v254_v43, %v3849_v35  ;;  %v3859_v48 = vrot.slane %v255_v44, %v3849_v35  ;;  %v342_v49 = vrot.slane %v262_v45, %v3849_v35  ;;  %v398_v50 = vrot.slane %v269_v46, %v3849_v35  ;;  %296 = vrot.lane.b32.xlu0 %v269_v46, %s3638_s2 }
 0x15d   :  { %288 = vrot.lane.b32.xlu1 %v262_v45, %s3638_s2  ;;  %v3865_v51 = vcombine.high %v262_v45, %v262_v45  ;;  %v3867_v52 = vcombine.high %v269_v46, %v269_v46 }
 0x15e   :  { %v349_v53 = vrot.slane %v342_v49, %v3849_v35  ;;  %v356_v54 = vrot.slane %v3856_v47, %v3849_v35  ;;  %v3874_v55 = vcombine.high %v3856_v47, %v3856_v47  ;;  %v3878_v56 = vcombine.high %v3859_v48, %v3859_v48 }
 0x15f   :  { %v370_v57 = vrot.slane %v3865_v51, %v3849_v35  ;;  %v405_v58 = vrot.slane %v398_v50, %v3849_v35  ;;  %v412_v59 = vrot.slane %v3859_v48, %v3849_v35  ;;  %v426_v60 = vrot.slane %v3867_v52, %v3849_v35 }
 0x160   :  { %v363_v61 = vrot.slane %v356_v54, %v3849_v35  ;;  %v448_v62 = vunpack.c.l.b16 %v349_v53  ;;  %312 = vrot.lane.b32.xlu0 %v269_v46, %s3639_s11  ;;  %v384_v63 = vrot.slane %v3874_v55, %v3849_v35  ;;  %v440_v0 = vrot.slane %v3878_v56, %v3849_v35 }
 0x161   :  { %304 = vrot.lane.b32.xlu1 %v262_v45, %s3639_s11  ;;  %v377_v2 = vrot.slane %v370_v57, %v3849_v35  ;;  %v419_v3 = vrot.slane %v412_v59, %v3849_v35  ;;  %v433_v4 = vrot.slane %v426_v60, %v3849_v35  ;;  %v452_v12 = vunpack.c.l.b16 %v405_v58 }
 0x162   :  { %v449_v6 = vunpack.c.l.b16 %v363_v61  ;;  %v391_v7 = vrot.slane %v384_v63, %v3849_v35  ;;  %v447_v9 = vrot.slane %v440_v0, %v3849_v35  ;;  %v1335_v10 = vrot.slane %v448_v62, 1 }
 0x163   :  { %v450_v11 = vunpack.c.l.b16 %v377_v2  ;;  %v453_v14 = vunpack.c.l.b16 %v419_v3  ;;  %v454_v17 = vunpack.c.l.b16 %v433_v4  ;;  %v465_v25 = vrot.slane %v452_v12, 4 }
 0x164   :  { %328 = vrot.lane.b32.xlu0 %v269_v46, %s3640_s25  ;;  %v451_v13 = vunpack.c.l.b16 %v391_v7  ;;  %v456_v15 = vrot.slane %v449_v6, 7  ;;  %v1336_v16 = vsel %vm457_vm2, %v449_v6, %v1335_v10  ;;  %v455_v20 = vunpack.c.l.b16 %v447_v9 }
 0x165   :  { %320 = vrot.lane.b32.xlu1 %v262_v45, %s3640_s25  ;;  %v459_v18 = vrot.slane %v450_v11, 6  ;;  %v1337_v19 = vrot.slane %v450_v11, 7  ;;  %v1341_v27 = vrot.slane %v452_v12, 5  ;;  %v468_v29 = vrot.slane %v453_v14, 3 }
 0x166   :  { %v458_v21 = vsel %vm457_vm2, %v456_v15, %v448_v62  ;;  %v462_v22 = vrot.slane %v451_v13, 5  ;;  %v1339_v23 = vrot.slane %v451_v13, 6  ;;  %v1343_v31 = vrot.slane %v453_v14, 4 }
 0x167   :  { %v461_v24 = vsel %vm460_vm3, %v459_v18, %v458_v21  ;;  %v1338_v26 = vsel %vm460_vm3, %v1337_v19, %v1336_v16  ;;  %v471_v33 = vrot.slane %v454_v17, 2  ;;  %v1345_v36 = vrot.slane %v454_v17, 3 }
 0x168   :  { %290 = vrot.lane.b32.xlu0 %v3856_v47, %s3638_s2  ;;  %v464_v28 = vsel %vm463_vm4, %v462_v22, %v461_v24  ;;  %v1340_v30 = vsel %vm463_vm4, %v1339_v23, %v1338_v26  ;;  %v474_v38 = vrot.slane %v455_v20, 1  ;;  %v1347_v40 = vrot.slane %v455_v20, 2 }
 0x169   :  { %298 = vrot.lane.b32.xlu1 %v3859_v48, %s3638_s2  ;;  %v467_v32 = vsel %vm466_vm5, %v465_v25, %v464_v28  ;;  %v1342_v34 = vsel %vm466_vm5, %v1341_v27, %v1340_v30 }
 0x16a   :  { %v470_v37 = vsel %vm469_vm6, %v468_v29, %v467_v32  ;;  %v1344_v39 = vsel %vm469_vm6, %v1343_v31, %v1342_v34 }
 0x16b   :  { %v473_v41 = vsel %vm472_vm7, %v471_v33, %v470_v37  ;;  %v1346_v42 = vsel %vm472_vm7, %v1345_v36, %v1344_v39 }
 0x16c   :  { %292 = vrot.lane.b32.xlu0 %v3865_v51, %s3638_s2  ;;  %v476_v43 = vsel %vm475_vm8, %v474_v38, %v473_v41  ;;  %v3921_v44 = vsel %vm475_vm8, %v1347_v40, %v1346_v42 }
 0x16d   :  { %308 = vrot.lane.b32.xlu1 %v3865_v51, %s3639_s11  ;;  %v3953_v45 = vpack.c.b16 %v476_v43, %v476_v43 }
 0x170   :  { %300 = vrot.lane.b32.xlu0 %v3867_v52, %s3638_s2 }
 0x171   :  { %324 = vrot.lane.b32.xlu1 %v3865_v51, %s3640_s25 }
 0x174   :  { %306 = vrot.lane.b32.xlu0 %v3856_v47, %s3639_s11 }
 0x175   :  { %314 = vrot.lane.b32.xlu1 %v3859_v48, %s3639_s11 }
 0x178   :  { %322 = vrot.lane.b32.xlu0 %v3856_v47, %s3640_s25 }
 0x179   :  { %316 = vrot.lane.b32.xlu1 %v3867_v52, %s3639_s11 }
 0x17c   :  { %330 = vrot.lane.b32.xlu0 %v3859_v48, %s3640_s25 }
 0x17d   :  { %294 = vrot.lane.b32.xlu1 %v3874_v55, %s3638_s2 }
 0x180   :  { %310 = vrot.lane.b32.xlu0 %v3874_v55, %s3639_s11 }
 0x181   :  { %302 = vrot.lane.b32.xlu1 %v3878_v56, %s3638_s2 }
 0x184   :  { %326 = vrot.lane.b32.xlu0 %v3874_v55, %s3640_s25 }
 0x185   :  { %318 = vrot.lane.b32.xlu1 %v3878_v56, %s3639_s11 }
 0x188   :  { %332 = vrot.lane.b32.xlu0 %v3867_v52, %s3640_s25 }
 0x189   :  { %334 = vrot.lane.b32.xlu1 %v3878_v56, %s3640_s25 }
 0x18c   :  { %478 = vrot.lane.b32.xlu0 %v3953_v45, %s3641_s12 }
 0x1ce   :  { %v297_v46 = vpop.permute.xlu0 %296 }
 0x1cf   :  { %v289_v47 = vpop.permute.xlu1 %288  ;;  %v589_v54 = vrot.slane %v297_v46, %v3849_v35 }
 0x1d0   :  { %v533_v49 = vrot.slane %v289_v47, %v3849_v35 }
 0x1d1   :  { %v596_v62 = vrot.slane %v589_v54, %v3849_v35 }
 0x1d2   :  { %v313_v48 = vpop.permute.xlu0 %312  ;;  %v3959_v53 = vrot.slane %v533_v49, %v3849_v35 }
 0x1d3   :  { %v305_v50 = vpop.permute.xlu1 %304  ;;  %v772_v59 = vrot.slane %v313_v48, %v3849_v35  ;;  %v643_v15 = vunpack.c.l.b16 %v596_v62 }
 0x1d4   :  { %v639_v56 = vunpack.c.l.b16 %v3959_v53  ;;  %v716_v60 = vrot.slane %v305_v50, %v3849_v35 }
 0x1d5   :  { %v779_v9 = vrot.slane %v772_v59, %v3849_v35  ;;  %v3990_v28 = vrot.slane %v643_v15, 4  ;;  %v3993_v32 = vrot.slane %v643_v15, 5 }
 0x1d6   :  { %v329_v51 = vpop.permute.xlu0 %328  ;;  %v1398_v3 = vrot.slane %v639_v56, 1  ;;  %v3976_v11 = vrot.slane %v716_v60, %v3849_v35 }
 0x1d7   :  { %v321_v52 = vpop.permute.xlu1 %320  ;;  %v955_v63 = vrot.slane %v329_v51, %v3849_v35  ;;  %v826_v22 = vunpack.c.l.b16 %v779_v9 }
 0x1d8   :  { %v899_v0 = vrot.slane %v321_v52, %v3849_v35  ;;  %v822_v25 = vunpack.c.l.b16 %v3976_v11 }
 0x1d9   :  { %v962_v16 = vrot.slane %v955_v63, %v3849_v35  ;;  %v3999_v38 = vrot.slane %v826_v22, 4  ;;  %v4004_v42 = vrot.slane %v826_v22, 5 }
 0x1da   :  { %v291_v55 = vpop.permute.xlu0 %290  ;;  %v3983_v17 = vrot.slane %v899_v0, %v3849_v35  ;;  %v1461_v43 = vrot.slane %v822_v25, 1 }
 0x1db   :  { %v299_v57 = vpop.permute.xlu1 %298  ;;  %v547_v58 = vrot.slane %v291_v55, %v3849_v35  ;;  %v1009_v29 = vunpack.c.l.b16 %v962_v16 }
 0x1dc   :  { %v603_v12 = vrot.slane %v299_v57, %v3849_v35  ;;  %v1005_v30 = vunpack.c.l.b16 %v3983_v17 }
 0x1dd   :  { %v554_v61 = vrot.slane %v547_v58, %v3849_v35  ;;  %v4007_v48 = vrot.slane %v1009_v29, 4  ;;  %v4009_v49 = vrot.slane %v1009_v29, 5 }
 0x1de   :  { %v293_v2 = vpop.permute.xlu0 %292  ;;  %v610_v26 = vrot.slane %v603_v12, %v3849_v35  ;;  %v1524_v50 = vrot.slane %v1005_v30, 1 }
 0x1df   :  { %v640_v4 = vunpack.c.l.b16 %v554_v61  ;;  %v309_v6 = vpop.permute.xlu1 %308  ;;  %v561_v7 = vrot.slane %v293_v2, %v3849_v35 }
 0x1e0   :  { %v744_v10 = vrot.slane %v309_v6, %v3849_v35  ;;  %v644_v46 = vunpack.c.l.b16 %v610_v26 }
 0x1e1   :  { %v1399_v13 = vsel %vm457_vm2, %v640_v4, %v1398_v3  ;;  %v568_v14 = vrot.slane %v561_v7, %v3849_v35  ;;  %v647_v51 = vrot.slane %v640_v4, 7 }
 0x1e2   :  { %v301_v18 = vpop.permute.xlu0 %300  ;;  %v751_v19 = vrot.slane %v744_v10, %v3849_v35  ;;  %v4014_v0 = vrot.slane %v644_v46, 3  ;;  %v4016_v2 = vrot.slane %v644_v46, 4 }
 0x1e3   :  { %v641_v20 = vunpack.c.l.b16 %v568_v14  ;;  %v325_v21 = vpop.permute.xlu1 %324  ;;  %v617_v24 = vrot.slane %v301_v18, %v3849_v35  ;;  %v648_v6 = vsel %vm457_vm2, %v647_v51, %v639_v56 }
 0x1e4   :  { %v927_v23 = vrot.slane %v325_v21, %v3849_v35  ;;  %v824_v33 = vunpack.c.l.b16 %v751_v19 }
 0x1e5   :  { %v1400_v27 = vrot.slane %v641_v20, 7  ;;  %v624_v40 = vrot.slane %v617_v24, %v3849_v35  ;;  %v649_v55 = vrot.slane %v641_v20, 6 }
 0x1e6   :  { %v307_v31 = vpop.permute.xlu0 %306  ;;  %v934_v39 = vrot.slane %v927_v23, %v3849_v35  ;;  %v1463_v54 = vrot.slane %v824_v33, 7  ;;  %v832_v12 = vrot.slane %v824_v33, 6 }
 0x1e7   :  { %v3996_v34 = vsel %vm460_vm3, %v1400_v27, %v1399_v13  ;;  %v315_v36 = vpop.permute.xlu1 %314  ;;  %v730_v37 = vrot.slane %v307_v31, %v3849_v35  ;;  %v645_v61 = vunpack.c.l.b16 %v624_v40  ;;  %v650_v13 = vsel %vm460_vm3, %v649_v55, %v648_v6 }
 0x1e8   :  { %v786_v41 = vrot.slane %v315_v36, %v3849_v35  ;;  %v1007_v60 = vunpack.c.l.b16 %v934_v39 }
 0x1e9   :  { %v737_v47 = vrot.slane %v730_v37, %v3849_v35  ;;  %v657_v18 = vrot.slane %v645_v61, 2  ;;  %v4030_v23 = vrot.slane %v645_v61, 3 }
 0x1ea   :  { %v323_v52 = vpop.permute.xlu0 %322  ;;  %v793_v62 = vrot.slane %v786_v41, %v3849_v35  ;;  %v1526_v17 = vrot.slane %v1007_v60, 7  ;;  %v1015_v31 = vrot.slane %v1007_v60, 6 }
 0x1eb   :  { %v823_v57 = vunpack.c.l.b16 %v737_v47  ;;  %v317_v58 = vpop.permute.xlu1 %316  ;;  %v913_v59 = vrot.slane %v323_v52, %v3849_v35 }
 0x1ec   :  { %v800_v63 = vrot.slane %v317_v58, %v3849_v35  ;;  %v827_v19 = vunpack.c.l.b16 %v793_v62 }
 0x1ed   :  { %v1462_v3 = vsel %vm457_vm2, %v823_v57, %v1461_v43  ;;  %v920_v4 = vrot.slane %v913_v59, %v3849_v35  ;;  %v830_v7 = vrot.slane %v823_v57, 7 }
 0x1ee   :  { %v1464_v9 = vsel %vm460_vm3, %v1463_v54, %v1462_v3  ;;  %v807_v10 = vrot.slane %v800_v63, %v3849_v35  ;;  %v331_v11 = vpop.permute.xlu0 %330  ;;  %v838_v40 = vrot.slane %v827_v19, 3  ;;  %v4037_v41 = vrot.slane %v827_v19, 4 }
 0x1ef   :  { %v1006_v14 = vunpack.c.l.b16 %v920_v4  ;;  %v969_v15 = vrot.slane %v331_v11, %v3849_v35  ;;  %v295_v16 = vpop.permute.xlu1 %294  ;;  %v831_v24 = vsel %vm457_vm2, %v830_v7, %v822_v25 }
 0x1f0   :  { %v575_v53 = vrot.slane %v295_v16, %v3849_v35  ;;  %v828_v20 = vunpack.c.l.b16 %v807_v10 }
 0x1f1   :  { %v1013_v56 = vrot.slane %v1006_v14, 7  ;;  %v1525_v21 = vsel %vm457_vm2, %v1006_v14, %v1524_v50  ;;  %v976_v22 = vrot.slane %v969_v15, %v3849_v35  ;;  %v833_v50 = vsel %vm460_vm3, %v832_v12, %v831_v24 }
 0x1f2   :  { %v1527_v26 = vsel %vm460_vm3, %v1526_v17, %v1525_v21  ;;  %v582_v27 = vrot.slane %v575_v53, %v3849_v35  ;;  %v311_v29 = vpop.permute.xlu0 %310  ;;  %v840_v25 = vrot.slane %v828_v20, 2  ;;  %v4040_v47 = vrot.slane %v828_v20, 3 }
 0x1f3   :  { %v1014_v33 = vsel %vm457_vm2, %v1013_v56, %v1005_v30  ;;  %v1010_v36 = vunpack.c.l.b16 %v976_v22  ;;  %v758_v37 = vrot.slane %v311_v29, %v3849_v35  ;;  %v303_v39 = vpop.permute.xlu1 %302 }
 0x1f4   :  { %v642_v43 = vunpack.c.l.b16 %v582_v27  ;;  %v631_v46 = vrot.slane %v303_v39, %v3849_v35  ;;  %v1016_v55 = vsel %vm460_vm3, %v1015_v31, %v1014_v33 }
 0x1f5   :  { %v765_v51 = vrot.slane %v758_v37, %v3849_v35  ;;  %v1021_v58 = vrot.slane %v1010_v36, 3  ;;  %v1532_v59 = vrot.slane %v1010_v36, 4 }
 0x1f6   :  { %v651_v52 = vrot.slane %v642_v43, 5  ;;  %v1402_v30 = vrot.slane %v642_v43, 6  ;;  %v638_v54 = vrot.slane %v631_v46, %v3849_v35  ;;  %v327_v57 = vpop.permute.xlu0 %326 }
 0x1f7   :  { %v825_v60 = vunpack.c.l.b16 %v765_v51  ;;  %v941_v61 = vrot.slane %v327_v57, %v3849_v35  ;;  %v319_v62 = vpop.permute.xlu1 %318 }
 0x1f8   :  { %v652_v63 = vsel %vm463_vm4, %v651_v52, %v650_v13  ;;  %v1403_v3 = vsel %vm463_vm4, %v1402_v30, %v3996_v34  ;;  %v646_v4 = vunpack.c.l.b16 %v638_v54  ;;  %v814_v6 = vrot.slane %v319_v62, %v3849_v35 }
 0x1f9   :  { %v834_v7 = vrot.slane %v825_v60, 5  ;;  %v1465_v10 = vrot.slane %v825_v60, 6  ;;  %v948_v11 = vrot.slane %v941_v61, %v3849_v35  ;;  %v654_v12 = vsel %vm466_vm5, %v3990_v28, %v652_v63 }
 0x1fa   :  { %v659_v14 = vrot.slane %v646_v4, 1  ;;  %v1410_v15 = vrot.slane %v646_v4, 2  ;;  %v821_v16 = vrot.slane %v814_v6, %v3849_v35  ;;  %v333_v17 = vpop.permute.xlu0 %332  ;;  %v656_v13 = vsel %vm469_vm6, %v4014_v0, %v654_v12 }
 0x1fb   :  { %v835_v34 = vsel %vm463_vm4, %v834_v7, %v833_v50  ;;  %v1466_v19 = vsel %vm463_vm4, %v1465_v10, %v1464_v9  ;;  %v1008_v53 = vunpack.c.l.b16 %v948_v11  ;;  %v983_v20 = vrot.slane %v333_v17, %v3849_v35  ;;  %v335_v56 = vpop.permute.xlu1 %334 }
 0x1fc   :  { %v829_v21 = vunpack.c.l.b16 %v821_v16  ;;  %v997_v22 = vrot.slane %v335_v56, %v3849_v35  ;;  %v658_v28 = vsel %vm472_vm7, %v657_v18, %v656_v13  ;;  %v837_v24 = vsel %vm466_vm5, %v3999_v38, %v835_v34 }
 0x1fd   :  { %v1017_v27 = vrot.slane %v1008_v53, 5  ;;  %v1528_v29 = vrot.slane %v1008_v53, 6  ;;  %v990_v0 = vrot.slane %v983_v20, %v3849_v35  ;;  %v660_v31 = vsel %vm475_vm8, %v659_v14, %v658_v28 }
 0x1fe   :  { %v842_v33 = vrot.slane %v829_v21, 1  ;;  %v1473_v9 = vrot.slane %v829_v21, 2  ;;  %v1004_v36 = vrot.slane %v997_v22, %v3849_v35  ;;  %v4067_v37 = vpack.c.b16 %v660_v31, %v660_v31  ;;  %v479_v39 = vpop.permute.xlu0 %478 }
 0x1ff   :  { %v1018_v43 = vsel %vm463_vm4, %v1017_v27, %v1016_v55  ;;  %v1529_v18 = vsel %vm463_vm4, %v1528_v29, %v1527_v26  ;;  %v1011_v46 = vunpack.c.l.b16 %v990_v0  ;;  %v485_v38 = vsel %vm480_vm9, %v479_v39, 0 }
 0x200   :  { %v1012_v50 = vunpack.c.l.b16 %v1004_v36  ;;  %662 = vrot.lane.b32.xlu1 %v4067_v37, %s3641_s12  ;;  %3243 = vmatpush3.bf16.xpose.msra.mxu1 %v485_v38  ;;  %v839_v51 = vsel %vm469_vm6, %v838_v40, %v837_v24  ;;  %v1020_v52 = vsel %vm466_vm5, %v4007_v48, %v1018_v43  ;;  %v1405_v30 = vsel %vm466_vm5, %v3993_v32, %v1403_v3 }
 0x201   :  { %v1023_v54 = vrot.slane %v1011_v46, 2  ;;  %v1534_v55 = vrot.slane %v1011_v46, 3  ;;  %v841_v26 = vsel %vm472_vm7, %v840_v25, %v839_v51  ;;  %v1022_v57 = vsel %vm469_vm6, %v1021_v58, %v1020_v52  ;;  %3254 = vmatprep.subr.bf16.mxu1 %v3634_v1 }
 0x202   :  { %v1025_v60 = vrot.slane %v1012_v50, 1  ;;  %v1536_v61 = vrot.slane %v1012_v50, 2  ;;  %v843_v62 = vsel %vm475_vm8, %v842_v33, %v841_v26  ;;  %v1407_v40 = vsel %vm469_vm6, %v4016_v2, %v1405_v30 }
 0x203   :  { %v4085_v63 = vpack.c.b16 %v843_v62, %v843_v62  ;;  %v1024_v48 = vsel %vm472_vm7, %v1023_v54, %v1022_v57  ;;  %v1409_v32 = vsel %vm472_vm7, %v4030_v23, %v1407_v40  ;;  %v1531_v25 = vsel %vm466_vm5, %v4009_v49, %v1529_v18 }
 0x204   :  { %v1026_v58 = vsel %vm475_vm8, %v1025_v60, %v1024_v48  ;;  %v4094_v3 = vsel %vm475_vm8, %v1410_v15, %v1409_v32  ;;  %v1533_v4 = vsel %vm469_vm6, %v1532_v59, %v1531_v25  ;;  %v1468_v2 = vsel %vm466_vm5, %v4004_v42, %v1466_v19 }
 0x205   :  { %845 = vrot.lane.b32.xlu0 %v4085_v63, %s3641_s12  ;;  %v1027_v6 = vpack.c.b16 %v1026_v58, %v1026_v58  ;;  %v1535_v7 = vsel %vm472_vm7, %v1534_v55, %v1533_v4  ;;  %v1470_v23 = vsel %vm469_vm6, %v4037_v41, %v1468_v2  ;;  %v4150_v40 = vpack.c.b16 %v4094_v3, %v4094_v3 }
 0x206   :  { %v4105_v49 = vsel %vm475_vm8, %v1536_v61, %v1535_v7  ;;  %v1472_v10 = vsel %vm472_vm7, %v4040_v47, %v1470_v23 }
 0x207   :  { %1028 = vrot.lane.b32.xlu1 %v1027_v6, %s3641_s12  ;;  %3245 = vmatmul.mubr.msk.bf16.vlgmr.msra.gmra.mrb[0].mxu1 %vm480_vm9, %v3953_v45  ;;  %v4113_v42 = vsel %vm475_vm8, %v1473_v9, %v1472_v10 }
 0x208   :  { %3256 = vmatprep.mubr.msk.bf16.mxu1 %vm3635_vm0, %v3634_v1  ;;  %v4176_v10 = vpack.c.b16 %v4113_v42, %v4113_v42 }
 0x272   :  { %v663_v59 = vpop.permute.xlu1 %662 }
 0x273   :  { %v668_v41 = vsel %vm480_vm9, %v663_v59, 0 }
 0x274   :  { %3249 = vmatpush3.bf16.xpose.msra.mxu0 %v668_v41 }
 0x275   :  { %3260 = vmatprep.subr.bf16.mxu0 %v3634_v1 }
 0x277   :  { %v846_v11 = vpop.permute.xlu0 %845 }
 0x278   :  { %v851_v47 = vsel %vm480_vm9, %v846_v11, 0 }
 0x279   :  { %3255 = vmatpush3.bf16.xpose.msra.mxu1 %v851_v47  ;;  %v1029_v12 = vpop.permute.xlu1 %1028 }
 0x27a   :  { %v1034_v14 = vsel %vm480_vm9, %v1029_v12, 0  ;;  %3266 = vmatprep.subr.bf16.mxu1 %v3634_v1 }
 0x27b   :  { %3251 = vmatmul.mubr.msk.bf16.vlgmr.msra.gmra.mrb[4].mxu0 %vm480_vm9, %v4067_v37 }
 0x27c   :  { %3261 = vmatpush3.bf16.xpose.msra.mxu0 %v1034_v14  ;;  %3262 = vmatprep.mubr.msk.bf16.mxu0 %vm3635_vm0, %v3634_v1 }
 0x27d   :  { %3272 = vmatprep.subr.bf16.mxu0 %v3634_v1 }
 0x280   :  { %3257 = vmatmul.mubr.msk.bf16.vlgmr.msra.gmra.mrb[4].mxu1 %vm480_vm9, %v4085_v63 }
 0x281   :  { %3268 = vmatprep.mubr.msk.bf16.mxu1 %vm3635_vm0, %v3634_v1 }
 0x283   :  { %3263 = vmatmul.mubr.msk.bf16.vlgmr.msra.gmra.mrb[8].mxu0 %vm480_vm9, %v1027_v6 }
 0x284   :  { %3274 = vmatprep.mubr.msk.bf16.mxu0 %vm3635_vm0, %v3634_v1 }
 0x2da   :  { %v521_v15 = vpop.f32.mrb[0].mxu1 }
 0x2db   :  { %v3246_v16 = vpop.f32.mrb[1].mxu1  ;;  %v1076_v17 = vsel %vm480_vm9, %v521_v15, -inf }
 0x2dc   :  { %1077 = vmax.xlane.f32.xlu0 %v1076_v17  ;;  %v524_v13 = vpop.f32.mrb[2].mxu1 }
 0x2dd   :  { %v3247_v34 = vpop.f32.mrb[3].mxu1 }
 0x34e   :  { %v704_v19 = vpop.f32.mrb[4].mxu0 }
 0x34f   :  { %v3252_v53 = vpop.f32.mrb[5].mxu0  ;;  %v1079_v20 = vsel %vm480_vm9, %v704_v19, -inf }
 0x350   :  { %1080 = vmax.xlane.f32.xlu1 %v1079_v20  ;;  %v707_v56 = vpop.f32.mrb[6].mxu0 }
 0x351   :  { %v3253_v21 = vpop.f32.mrb[7].mxu0 }
 0x353   :  { %v887_v22 = vpop.f32.mrb[4].mxu1 }
 0x354   :  { %v3258_v28 = vpop.f32.mrb[5].mxu1  ;;  %v1082_v24 = vsel %vm480_vm9, %v887_v22, -inf }
 0x355   :  { %1083 = vmax.xlane.f32.xlu0 %v1082_v24  ;;  %v890_v27 = vpop.f32.mrb[6].mxu1 }
 0x356   :  { %v3259_v29 = vpop.f32.mrb[7].mxu1  ;;  %v1070_v0 = vpop.f32.mrb[8].mxu0 }
 0x357   :  { %v3264_v31 = vpop.f32.mrb[9].mxu0  ;;  %v1085_v33 = vsel %vm480_vm9, %v1070_v0, -inf }
 0x358   :  { %v1073_v9 = vpop.f32.mrb[10].mxu0 }
 0x359   :  { %1086 = vmax.xlane.f32.xlu0 %v1085_v33  ;;  %v3265_v36 = vpop.f32.mrb[11].mxu0 }
 0x361   :  { %1124 = vrot.lane.b32.xlu1 %v3953_v45, %s3642_s29 }
 0x369   :  { %v1078_v39 = vpop.xlane.xlu0 %1077 }
 0x36a   :  { %v1088_v43 = vsub.f32 %v521_v15, %v1078_v39 }
 0x36c   :  { %v1092_v18 = vmul.f32 1.442695, %v1088_v43 }
 0x36e   :  { %3416 = vpow2.f32 %v1092_v18 }
 0x378   :  { %v3417_v46 = vpop.eup %3416 }
 0x379   :  { %v1100_v38 = vsel %vm480_vm9, %v3417_v46, 0.0 }
 0x385   :  { %1101 = vadd.xlane.f32.xlu1 %v1100_v38 }
 0x396   :  { %1221 = vrot.lane.b32.xlu1 %v4085_v63, %s3642_s29  ;;  %v4158_v63 = vpack.c.b16 %v4105_v49, %v4105_v49  ;;  %v4170_v49 = vpack.c.b16 %v3921_v44, %v3921_v44 }
 0x39a   :  { %1269 = vrot.lane.b32.xlu1 %v1027_v6, %s3642_s29 }
 0x3dd   :  { %v1081_v50 = vpop.xlane.xlu1 %1080 }
 0x3de   :  { %v1089_v51 = vsub.f32 %v704_v19, %v1081_v50 }
 0x3e0   :  { %v1094_v52 = vmul.f32 1.442695, %v1089_v51 }
 0x3e1   :  { %v1125_v30 = vpop.permute.xlu1 %1124 }
 0x3e2   :  { %3418 = vpow2.f32 %v1094_v52  ;;  %v1084_v45 = vpop.xlane.xlu0 %1083  ;;  %v1131_v54 = vsel %vm1129_vm10, %v1125_v30, 0 }
 0x3e3   :  { %v1090_v55 = vsub.f32 %v887_v22, %v1084_v45  ;;  %3267 = vmatpush3.bf16.msra.mxu1 %v1131_v54 }
 0x3e4   :  { %3278 = vmatprep.subr.bf16.mxu1 %v3634_v1 }
 0x3e5   :  { %v1096_v26 = vmul.f32 1.442695, %v1090_v55 }
 0x3e6   :  { %v1087_v48 = vpop.xlane.xlu0 %1086 }
 0x3e7   :  { %3420 = vpow2.f32 %v1096_v26  ;;  %v1091_v32 = vsub.f32 %v1070_v0, %v1087_v48 }
 0x3e9   :  { %v1098_v25 = vmul.f32 1.442695, %v1091_v32 }
 0x3ec   :  { %v3419_v57 = vpop.eup %3418 }
 0x3ed   :  { %v1103_v60 = vsel %vm480_vm9, %v3419_v57, 0.0 }
 0x3ee   :  { %1104 = vadd.xlane.f32.xlu0 %v1103_v60 }
 0x3f1   :  { %v3421_v61 = vpop.eup %3420 }
 0x3f2   :  { %v1106_v62 = vsel %vm480_vm9, %v3421_v61, 0.0 }
 0x3f3   :  { %1107 = vadd.xlane.f32.xlu1 %v1106_v62 }
 0x404   :  { %1413 = vrot.lane.b32.xlu1 %v4150_v40, %s3641_s12  ;;  %1173 = vrot.lane.b32.xlu0 %v4067_v37, %s3642_s29 }
 0x408   :  { %1539 = vrot.lane.b32.xlu1 %v4158_v63, %s3641_s12 }
 0x412   :  { %v1102_v58 = vpop.xlane.xlu1 %1101 }
 0x413   :  { %3422 = vrcp.f32 %v1102_v58 }
 0x414   :  { %3424 = vpow2.f32 %v1098_v25 }
 0x416   :  { %v1222_v6 = vpop.permute.xlu1 %1221 }
 0x417   :  { %v1227_v37 = vsel %vm1129_vm10, %v1222_v6, 0 }
 0x41a   :  { %v1270_v41 = vpop.permute.xlu1 %1269 }
 0x41b   :  { %v1275_v42 = vsel %vm1129_vm10, %v1270_v41, 0 }
 0x41d   :  { %v3423_v3 = vpop.eup %3422 }
 0x41e   :  { %v1116_v4 = vmul.f32 %v3423_v3, %v3417_v46  ;;  %v3425_v2 = vpop.eup %3424 }
 0x41f   :  { %v1109_v23 = vsel %vm480_vm9, %v3425_v2, 0.0 }
 0x420   :  { %v1120_v7 = vpack.c.bf16 %v1116_v4, %v1116_v4 }
 0x422   :  { %3269 = vmatmul.mubr.msk.bf16.vlgmr.msra.gmra.mrb[8].mxu1 %vm480_vm9, %v1120_v7 }
 0x423   :  { %3279 = vmatpush3.bf16.msra.mxu1 %v1227_v37  ;;  %1110 = vadd.xlane.f32.xlu0 %v1109_v23 }
 0x424   :  { %3280 = vmatprep.mubr.msk.bf16.mxu1 %vm3635_vm0, %v3634_v1  ;;  %3290 = vmatprep.subr.bf16.mxu1 %v3634_v1 }
 0x439   :  { %1350 = vrot.lane.b32.xlu0 %v4170_v49, %s3641_s12 }
 0x43d   :  { %1476 = vrot.lane.b32.xlu0 %v4176_v10, %s3641_s12 }
 0x47b   :  { %v1105_v59 = vpop.xlane.xlu0 %1104 }
 0x47c   :  { %3426 = vrcp.f32 %v1105_v59 }
 0x47f   :  { %v1174_v11 = vpop.permute.xlu0 %1173 }
 0x480   :  { %v1108_v47 = vpop.xlane.xlu1 %1107  ;;  %v1179_v12 = vsel %vm1129_vm10, %v1174_v11, 0 }
 0x481   :  { %3428 = vrcp.f32 %v1108_v47  ;;  %3273 = vmatpush3.bf16.msra.mxu0 %v1179_v12 }
 0x482   :  { %3284 = vmatprep.subr.bf16.mxu0 %v3634_v1 }
 0x484   :  { %v1414_v22 = vpop.permute.xlu1 %1413 }
 0x485   :  { %v1419_v27 = vsel %vm480_vm9, %v1414_v22, 0 }
 0x486   :  { %v3427_v44 = vpop.eup %3426 }
 0x487   :  { %v1117_v14 = vmul.f32 %v3427_v44, %v3419_v57 }
 0x488   :  { %v1540_v29 = vpop.permute.xlu1 %1539 }
 0x489   :  { %v1121_v15 = vpack.c.bf16 %v1117_v14, %v1117_v14  ;;  %v1545_v0 = vsel %vm480_vm9, %v1540_v29, 0 }
 0x48b   :  { %v3429_v16 = vpop.eup %3428  ;;  %3275 = vmatmul.mubr.msk.bf16.vlgmr.msra.gmra.mrb[12].mxu0 %vm480_vm9, %v1121_v15 }
 0x48c   :  { %v1118_v17 = vmul.f32 %v3429_v16, %v3421_v61  ;;  %3285 = vmatpush3.bf16.msra.mxu0 %v1275_v42  ;;  %3286 = vmatprep.mubr.msk.bf16.mxu0 %vm3635_vm0, %v3634_v1 }
 0x48d   :  { %3296 = vmatprep.subr.bf16.mxu0 %v3634_v1 }
 0x48e   :  { %v1122_v13 = vpack.c.bf16 %v1118_v17, %v1118_v17 }
 0x490   :  { %3281 = vmatmul.mubr.msk.bf16.vlgmr.msra.gmra.mrb[12].mxu1 %vm480_vm9, %v1122_v13 }
 0x491   :  { %3292 = vmatprep.mubr.msk.bf16.mxu1 %vm3635_vm0, %v3634_v1 }
 0x4b0   :  { %v1111_v34 = vpop.xlane.xlu0 %1110 }
 0x4b1   :  { %3430 = vrcp.f32 %v1111_v34 }
 0x4b4   :  { %v1351_v19 = vpop.permute.xlu0 %1350 }
 0x4b5   :  { %v1356_v53 = vsel %vm480_vm9, %v1351_v19, 0 }
 0x4b6   :  { %3291 = vmatpush3.bf16.xpose.msra.mxu1 %v1356_v53 }
 0x4b7   :  { %3302 = vmatprep.subr.bf16.mxu1 %v3634_v1 }
 0x4b8   :  { %v1477_v20 = vpop.permute.xlu0 %1476 }
 0x4b9   :  { %v1482_v28 = vsel %vm480_vm9, %v1477_v20, 0 }
 0x4bb   :  { %v3431_v56 = vpop.eup %3430 }
 0x4bc   :  { %v1119_v21 = vmul.f32 %v3431_v56, %v3425_v2 }
 0x4bd   :  { %3293 = vmatmul.mubr.msk.bf16.vlgmr.msra.gmra.mrb[16].mxu1 %vm480_vm9, %v4170_v49 }
 0x4be   :  { %3303 = vmatpush3.bf16.xpose.msra.mxu1 %v1482_v28  ;;  %v1123_v24 = vpack.c.bf16 %v1119_v21, %v1119_v21  ;;  %3304 = vmatprep.mubr.msk.bf16.mxu1 %vm3635_vm0, %v3634_v1 }
 0x4bf   :  { %3314 = vmatprep.subr.bf16.mxu1 %v3634_v1 }
 0x4c0   :  { %3287 = vmatmul.mubr.msk.bf16.vlgmr.msra.gmra.mrb[16].mxu0 %vm480_vm9, %v1123_v24 }
 0x4c1   :  { %3297 = vmatpush3.bf16.xpose.msra.mxu0 %v1419_v27  ;;  %3298 = vmatprep.mubr.msk.bf16.mxu0 %vm3635_vm0, %v3634_v1 }
 0x4c2   :  { %3308 = vmatprep.subr.bf16.mxu0 %v3634_v1 }
 0x4c5   :  { %3305 = vmatmul.mubr.msk.bf16.vlgmr.msra.gmra.mrb[20].mxu1 %vm480_vm9, %v4176_v10 }
 0x4c6   :  { %3316 = vmatprep.mubr.msk.bf16.mxu1 %vm3635_vm0, %v3634_v1 }
 0x4c8   :  { %3299 = vmatmul.mubr.msk.bf16.vlgmr.msra.gmra.mrb[20].mxu0 %vm480_vm9, %v4150_v40 }
 0x4c9   :  { %3309 = vmatpush3.bf16.xpose.msra.mxu0 %v1545_v0  ;;  %3310 = vmatprep.mubr.msk.bf16.mxu0 %vm3635_vm0, %v3634_v1 }
 0x4ca   :  { %3320 = vmatprep.subr.bf16.mxu0 %v3634_v1 }
 0x4d0   :  { %3311 = vmatmul.mubr.msk.bf16.vlgmr.msra.gmra.mrb[24].mxu0 %vm480_vm9, %v4158_v63 }
 0x4d1   :  { %3322 = vmatprep.mubr.msk.bf16.mxu0 %vm3635_vm0, %v3634_v1 }
 0x4f5   :  { %v4217_v31 = vpop.f32.mrb[8].mxu1 }
 0x4f6   :  { %v3270_v33 = vpop.f32.mrb[9].mxu1 }
 0x4f7   :  { %v1170_v9 = vpop.f32.mrb[10].mxu1 }
 0x4f8   :  { %v3271_v36 = vpop.f32.mrb[11].mxu1 }
 0x55e   :  { %v4219_v39 = vpop.f32.mrb[12].mxu0 }
 0x55f   :  { %v3276_v43 = vpop.f32.mrb[13].mxu0 }
 0x560   :  { %v1218_v18 = vpop.f32.mrb[14].mxu0 }
 0x561   :  { %v3277_v46 = vpop.f32.mrb[15].mxu0 }
 0x563   :  { %v4221_v38 = vpop.f32.mrb[12].mxu1 }
 0x564   :  { %v3282_v50 = vpop.f32.mrb[13].mxu1 }
 0x565   :  { %v1266_v51 = vpop.f32.mrb[14].mxu1 }
 0x566   :  { %v3283_v52 = vpop.f32.mrb[15].mxu1 }
 0x590   :  { %v1392_v30 = vpop.f32.mrb[16].mxu1 }
 0x591   :  { %v3294_v45 = vpop.f32.mrb[17].mxu1  ;;  %v1587_v54 = vsel %vm480_vm9, %v1392_v30, -inf }
 0x592   :  { %1588 = vmax.xlane.f32.xlu0 %v1587_v54  ;;  %v1395_v55 = vpop.f32.mrb[18].mxu1 }
 0x593   :  { %v4224_v26 = vpop.f32.mrb[16].mxu0  ;;  %v3295_v57 = vpop.f32.mrb[19].mxu1 }
 0x594   :  { %v3288_v60 = vpop.f32.mrb[17].mxu0 }
 0x595   :  { %v1314_v61 = vpop.f32.mrb[18].mxu0 }
 0x596   :  { %v3289_v62 = vpop.f32.mrb[19].mxu0 }
 0x598   :  { %v1518_v48 = vpop.f32.mrb[20].mxu1 }
 0x599   :  { %v3306_v32 = vpop.f32.mrb[21].mxu1  ;;  %v1593_v25 = vsel %vm480_vm9, %v1518_v48, -inf }
 0x59a   :  { %1594 = vmax.xlane.f32.xlu0 %v1593_v25  ;;  %v1521_v58 = vpop.f32.mrb[22].mxu1 }
 0x59b   :  { %v1455_v3 = vpop.f32.mrb[20].mxu0  ;;  %v3307_v4 = vpop.f32.mrb[23].mxu1 }
 0x59c   :  { %v3300_v2 = vpop.f32.mrb[21].mxu0  ;;  %v1590_v6 = vsel %vm480_vm9, %v1455_v3, -inf }
 0x59d   :  { %1591 = vmax.xlane.f32.xlu1 %v1590_v6  ;;  %v1458_v7 = vpop.f32.mrb[22].mxu0 }
 0x59e   :  { %v3301_v37 = vpop.f32.mrb[23].mxu0 }
 0x5a3   :  { %v1581_v23 = vpop.f32.mrb[24].mxu0 }
 0x5a4   :  { %v3312_v59 = vpop.f32.mrb[25].mxu0  ;;  %v1596_v41 = vsel %vm480_vm9, %v1581_v23, -inf }
 0x5a5   :  { %1597 = vmax.xlane.f32.xlu0 %v1596_v41  ;;  %v1584_v11 = vpop.f32.mrb[26].mxu0 }
 0x5a6   :  { %v3313_v47 = vpop.f32.mrb[27].mxu0 }
 0x5ae   :  { %1635 = vrot.lane.b32.xlu1 %v4170_v49, %s3642_s29 }
 0x61f   :  { %v1589_v12 = vpop.xlane.xlu0 %1588 }
 0x620   :  { %v1599_v44 = vsub.f32 %v1392_v30, %v1589_v12 }
 0x622   :  { %v1603_v14 = vmul.f32 1.442695, %v1599_v44 }
 0x624   :  { %3432 = vpow2.f32 %v1603_v14 }
 0x627   :  { %v1595_v15 = vpop.xlane.xlu0 %1594 }
 0x628   :  { %v1601_v16 = vsub.f32 %v1518_v48, %v1595_v15 }
 0x62a   :  { %v1607_v42 = vmul.f32 1.442695, %v1601_v16  ;;  %v1592_v17 = vpop.xlane.xlu1 %1591 }
 0x62b   :  { %v1600_v13 = vsub.f32 %v1455_v3, %v1592_v17  ;;  %v3408_v17 = vld [vmem:[%s4514_s3] sm:$0xff]  }
 0x62c   :  { %3434 = vpow2.f32 %v1607_v42 }
 0x62d   :  { %v1605_v34 = vmul.f32 1.442695, %v1600_v13 }
 0x62e   :  { %v3433_v19 = vpop.eup %3432  ;;  %v1636_v53 = vpop.permute.xlu1 %1635 }
 0x62f   :  { %3436 = vpow2.f32 %v1605_v34  ;;  %v1641_v20 = vsel %vm1129_vm10, %v1636_v53, 0  ;;  %v1611_v56 = vsel %vm480_vm9, %v3433_v19, 0.0 }
 0x630   :  { %1612 = vadd.xlane.f32.xlu1 %v1611_v56  ;;  %3315 = vmatpush3.bf16.msra.mxu1 %v1641_v20 }
 0x631   :  { %3326 = vmatprep.subr.bf16.mxu1 %v3634_v1 }
 0x632   :  { %v1598_v49 = vpop.xlane.xlu0 %1597 }
 0x633   :  { %v1602_v21 = vsub.f32 %v1581_v23, %v1598_v49 }
 0x635   :  { %v1609_v22 = vmul.f32 1.442695, %v1602_v21 }
 0x636   :  { %v3435_v28 = vpop.eup %3434 }
 0x637   :  { %3438 = vpow2.f32 %v1609_v22  ;;  %v1617_v24 = vsel %vm480_vm9, %v3435_v28, 0.0 }
 0x638   :  { %1618 = vadd.xlane.f32.xlu1 %v1617_v24 }
 0x639   :  { %v3437_v27 = vpop.eup %3436 }
 0x63a   :  { %v1614_v29 = vsel %vm480_vm9, %v3437_v27, 0.0 }
 0x63b   :  { %1615 = vadd.xlane.f32.xlu0 %v1614_v29 }
 0x641   :  { %v3439_v0 = vpop.eup %3438 }
 0x642   :  { %v1620_v33 = vsel %vm480_vm9, %v3439_v0, 0.0 }
 0x643   :  { %1621 = vadd.xlane.f32.xlu0 %v1620_v33 }
 0x649   :  { %1731 = vrot.lane.b32.xlu1 %v4176_v10, %s3642_s29 }
 0x64d   :  { %1779 = vrot.lane.b32.xlu1 %v4158_v63, %s3642_s29 }
 0x659   :  { %1683 = vrot.lane.b32.xlu0 %v4150_v40, %s3642_s29 }
 0x6bd   :  { %v1613_v9 = vpop.xlane.xlu1 %1612 }
 0x6be   :  { %3440 = vrcp.f32 %v1613_v9 }
 0x6c5   :  { %v1619_v36 = vpop.xlane.xlu1 %1618 }
 0x6c6   :  { %3442 = vrcp.f32 %v1619_v36 }
 0x6c8   :  { %v3441_v43 = vpop.eup %3440  ;;  %v1616_v18 = vpop.xlane.xlu0 %1615 }
 0x6c9   :  { %v1627_v46 = vmul.f32 %v3441_v43, %v3433_v19  ;;  %3444 = vrcp.f32 %v1616_v18  ;;  %v1732_v50 = vpop.permute.xlu1 %1731 }
 0x6ca   :  { %v1737_v52 = vsel %vm1129_vm10, %v1732_v50, 0 }
 0x6cb   :  { %v1631_v51 = vpack.c.bf16 %v1627_v46, %v1627_v46 }
 0x6cd   :  { %3317 = vmatmul.mubr.msk.bf16.vlgmr.msra.gmra.mrb[24].mxu1 %vm480_vm9, %v1631_v51  ;;  %v1780_v60 = vpop.permute.xlu1 %1779  ;;  %v1919_v51 = vsub.s32 0, %v3801_v5 }
 0x6ce   :  { %3327 = vmatpush3.bf16.msra.mxu1 %v1737_v52  ;;  %3328 = vmatprep.mubr.msk.bf16.mxu1 %vm3635_vm0, %v3634_v1  ;;  %v1785_v62 = vsel %vm1129_vm10, %v1780_v60, 0 }
 0x6cf   :  { %3338 = vmatprep.subr.bf16.mxu1 %v3634_v1 }
 0x6d0   :  { %v3443_v40 = vpop.eup %3442  ;;  %v1622_v63 = vpop.xlane.xlu0 %1621 }
 0x6d1   :  { %v1629_v10 = vmul.f32 %v3443_v40, %v3435_v28  ;;  %3446 = vrcp.f32 %v1622_v63 }
 0x6d3   :  { %v3445_v30 = vpop.eup %3444  ;;  %v1633_v45 = vpack.c.bf16 %v1629_v10, %v1629_v10 }
 0x6d4   :  { %v1628_v54 = vmul.f32 %v3445_v30, %v3437_v27  ;;  %v1684_v55 = vpop.permute.xlu0 %1683 }
 0x6d5   :  { %v1689_v57 = vsel %vm1129_vm10, %v1684_v55, 0  ;;  %3329 = vmatmul.mubr.msk.bf16.vlgmr.msra.gmra.mrb[28].mxu1 %vm480_vm9, %v1633_v45 }
 0x6d6   :  { %3321 = vmatpush3.bf16.msra.mxu0 %v1689_v57  ;;  %v1632_v61 = vpack.c.bf16 %v1628_v54, %v1628_v54  ;;  %3342 = vmatprep.mubr.msk.bf16.mxu1 %vm3635_vm0, %v3634_v1 }
 0x6d7   :  { %3332 = vmatprep.subr.bf16.mxu0 %v3634_v1  ;;  %3339 = vmatpush3.bf16.msra.mxu1 %v3408_v17 }
 0x6d8   :  { %3340 = vmatprep.subr.bf16.mxu1 %v3634_v1 }
 0x6d9   :  { %3323 = vmatmul.mubr.msk.bf16.vlgmr.msra.gmra.mrb[28].mxu0 %vm480_vm9, %v1632_v61 }
 0x6da   :  { %3333 = vmatpush3.bf16.msra.mxu0 %v1785_v62  ;;  %3334 = vmatprep.mubr.msk.bf16.mxu0 %vm3635_vm0, %v3634_v1 }
 0x6db   :  { %v3447_v48 = vpop.eup %3446  ;;  %3346 = vmatprep.subr.bf16.mxu0 %v3634_v1 }
 0x6dc   :  { %v1630_v32 = vmul.f32 %v3447_v48, %v3439_v0 }
 0x6de   :  { %v1634_v25 = vpack.c.bf16 %v1630_v32, %v1630_v32 }
 0x6e1   :  { %3335 = vmatmul.mubr.msk.bf16.vlgmr.msra.gmra.mrb[32].mxu0 %vm480_vm9, %v1634_v25 }
 0x6e2   :  { %3350 = vmatprep.mubr.msk.bf16.mxu0 %vm3635_vm0, %v3634_v1 }
 0x7a0   :  { %v1677_v58 = vpop.f32.mrb[24].mxu1 }
 0x7a1   :  { %v3318_v3 = vpop.f32.mrb[25].mxu1 }
 0x7a2   :  { %v1680_v4 = vpop.f32.mrb[26].mxu1 }
 0x7a3   :  { %v3319_v2 = vpop.f32.mrb[27].mxu1 }
 0x7a8   :  { %v1773_v6 = vpop.f32.mrb[28].mxu1 }
 0x7a9   :  { %v3396_v7 = vpack.i.bf16 %v1773_v6, %v4221_v38  ;;  %v3330_v37 = vpop.f32.mrb[29].mxu1 }
 0x7aa   :  { %v1776_v23 = vpop.f32.mrb[30].mxu1 }
 0x7ab   :  { %3397 = vrot.lane.b32.xlu1 %v3396_v7, %s3643_s28  ;;  %v3331_v59 = vpop.f32.mrb[31].mxu1 }
 0x7ac   :  { %v1725_v41 = vpop.f32.mrb[28].mxu0 }
 0x7ad   :  { %v3391_v11 = vpack.i.bf16 %v1725_v41, %v4219_v39  ;;  %v3324_v47 = vpop.f32.mrb[29].mxu0  ;;  %v3409_v39 = vld [vmem:[%s4514_s3 + $0x8] sm:$0xff]  }
 0x7ae   :  { %v1728_v12 = vpop.f32.mrb[30].mxu0  ;;  %3341 = vmatpush3.bf16.msra.mxu1 %v3409_v39 }
 0x7af   :  { %3392 = vrot.lane.b32.xlu0 %v3391_v11, %s3644_s30  ;;  %v3325_v44 = vpop.f32.mrb[31].mxu0  ;;  %3354 = vmatprep.subr.bf16.mxu1 %v3634_v1 }
 0x7b4   :  { %v1821_v14 = vpop.f32.mrb[32].mxu0 }
 0x7b5   :  { %v3401_v15 = vpack.i.bf16 %v1821_v14, %v4224_v26  ;;  %v3336_v16 = vpop.f32.mrb[33].mxu0 }
 0x7b6   :  { %v1824_v42 = vpop.f32.mrb[34].mxu0 }
 0x7b7   :  { %3402 = vrot.lane.b32.xlu0 %v3401_v15, %s3645_s14  ;;  %v3337_v38 = vpop.f32.mrb[35].mxu0 }
 0x81d   :  { %v3398_v19 = vpop.permute.xlu1 %3397 }
 0x81e   :  { %v3400_v56 = vunpack.i.h.bf16 %v3398_v19  ;;  %v3399_v49 = vunpack.i.l.bf16 %v3398_v19 }
 0x821   :  { %v3393_v26 = vpop.permute.xlu0 %3392 }
 0x822   :  { %v3395_v13 = vunpack.i.h.bf16 %v3393_v26  ;;  %v3394_v34 = vunpack.i.l.bf16 %v3393_v26 }
 0x824   :  { %v1839_v53 = vsel %vm480_vm9, %v1677_v58, %v3395_v13  ;;  %v1329_v20 = vsel %vm480_vm9, %v4217_v31, %v3394_v34 }
 0x825   :  { %v1331_v24 = vsel %vm1330_vm11, %v1329_v20, %v3399_v49  ;;  %v1840_v27 = vsel %vm1330_vm11, %v1839_v53, %v3400_v56 }
 0x829   :  { %v3403_v21 = vpop.permute.xlu0 %3402 }
 0x82a   :  { %v3405_v22 = vunpack.i.h.bf16 %v3403_v21  ;;  %v3404_v28 = vunpack.i.l.bf16 %v3403_v21 }
 0x82c   :  { %v1841_v29 = vsel %vm1332_vm12, %v1840_v27, %v3405_v22  ;;  %v1333_v0 = vsel %vm1332_vm12, %v1331_v24, %v3404_v28 }
 0x82d   :  { %v1842_v33 = vpack.c.bf16 %v1841_v29, %v1841_v29  ;;  %v1334_v9 = vpack.c.bf16 %v1333_v0, %v1333_v0 }
 0x82f   :  { %v1883_v36 = vrot.slane %v1842_v33, %v3849_v35  ;;  %v1850_v43 = vrot.slane %v1334_v9, %v3849_v35 }
 0x831   :  { %v1884_v18 = vcombine.high %v1883_v36, %v1883_v36  ;;  %v1891_v31 = vrot.slane %v1883_v36, %v3849_v35  ;;  %v1851_v46 = vcombine.high %v1850_v43, %v1850_v43  ;;  %v1858_v50 = vrot.slane %v1850_v43, %v3849_v35 }
 0x833   :  { %v1898_v52 = vrot.slane %v1884_v18, %v3849_v35  ;;  %v1899_v40 = vcombine.high %v1891_v31, %v1891_v31  ;;  %v1902_v63 = vunpack.i.h.s16 %v1891_v31  ;;  %v3166_v10 = vpack.i.b16 %v1891_v31, %v1891_v31 }
 0x834   :  { %v1865_v30 = vrot.slane %v1851_v46, %v3849_v35  ;;  %v1866_v45 = vcombine.high %v1858_v50, %v1858_v50  ;;  %v1869_v54 = vunpack.i.h.s16 %v1858_v50  ;;  %v3162_v55 = vpack.i.b16 %v1858_v50, %v1858_v50 }
 0x835   :  { %v1900_v57 = vcombine.high %v1898_v52, %v1898_v52  ;;  %v1904_v60 = vunpack.i.h.s16 %v1898_v52  ;;  %v1906_v61 = vunpack.i.h.s16 %v1899_v40  ;;  %v1958_v62 = vpack.i.b16 %v1902_v63, %v1902_v63 }
 0x836   :  { %v3167_v48 = vpack.i.b16 %v1898_v52, %v1898_v52  ;;  %v3168_v32 = vpack.i.b16 %v1899_v40, %v1899_v40  ;;  %v1968_v25 = vrot.slane %v3166_v10, %v1919_v51  ;;  %v1867_v58 = vcombine.high %v1865_v30, %v1865_v30 }
 0x837   :  { %v1908_v3 = vunpack.i.h.s16 %v1900_v57  ;;  %v1960_v4 = vpack.i.b16 %v1904_v60, %v1904_v60  ;;  %v1962_v2 = vpack.i.b16 %v1906_v61, %v1906_v61  ;;  %v3169_v6 = vpack.i.b16 %v1900_v57, %v1900_v57  ;;  %v3170_v57 = vld [vmem:[%s4515_s4] ss:$0 sm:$0xff] }
 0x838   :  { %v1972_v7 = vrot.slane %v1958_v62, %v1919_v51  ;;  %v1976_v37 = vrot.slane %v3167_v48, %v1919_v51  ;;  %v1984_v23 = vrot.slane %v3168_v32, %v1919_v51  ;;  %v1871_v59 = vunpack.i.h.s16 %v1865_v30 }
 0x839   :  { %v1964_v41 = vpack.i.b16 %v1908_v3, %v1908_v3  ;;  %v1980_v11 = vrot.slane %v1960_v4, %v1919_v51  ;;  %v1988_v47 = vrot.slane %v1962_v2, %v1919_v51  ;;  %v1992_v12 = vrot.slane %v3169_v6, %v1919_v51 }
 0x83a   :  { %v1873_v44 = vunpack.i.h.s16 %v1866_v45  ;;  %v1875_v14 = vunpack.i.h.s16 %v1867_v58  ;;  %v1910_v15 = vpack.i.b16 %v1869_v54, %v1869_v54  ;;  %v3163_v16 = vpack.i.b16 %v1865_v30, %v1865_v30 }
 0x83b   :  { %v1996_v42 = vrot.slane %v1964_v41, %v1919_v51  ;;  %v1912_v38 = vpack.i.b16 %v1871_v59, %v1871_v59  ;;  %v3164_v17 = vpack.i.b16 %v1866_v45, %v1866_v45  ;;  %v3165_v39 = vpack.i.b16 %v1867_v58, %v1867_v58  ;;  %v3457_v59 = vld [vmem:[%s4511_s0 + $0x2] sm:$0x3] }
 0x83c   :  { %v1914_v13 = vpack.i.b16 %v1873_v44, %v1873_v44  ;;  %v1916_v34 = vpack.i.b16 %v1875_v14, %v1875_v14  ;;  %v1920_v19 = vrot.slane %v3162_v55, %v1919_v51  ;;  %v1924_v53 = vrot.slane %v1910_v15, %v1919_v51  ;;  %v3459_v15 = vld [vmem:[%s4511_s0 + $0x6] sm:$0x3] }
 0x83d   :  { %v1928_v20 = vrot.slane %v3163_v16, %v1919_v51  ;;  %v1932_v56 = vrot.slane %v1912_v38, %v1919_v51  ;;  %v1936_v49 = vrot.slane %v3164_v17, %v1919_v51  ;;  %v1944_v21 = vrot.slane %v3165_v39, %v1919_v51  ;;  %v3460_v38 = vld [vmem:[%s4511_s0 + $0x8] sm:$0x3]  ;;  %v3461_v39 = vld [vmem:[%s4511_s0 + $0xa] sm:$0x3] }
 0x83e   :  { %v1940_v22 = vrot.slane %v1914_v13, %v1919_v51  ;;  %v1948_v28 = vrot.slane %v1916_v34, %v1919_v51  ;;  %v2008_v24 = vsel %vm4284_vm15, %v1920_v19, %v1968_v25  ;;  %v2009_v27 = vsel %vm4284_vm15, %v1924_v53, %v1972_v7  ;;  %v3462_v13 = vld [vmem:[%s4511_s0 + $0xc] sm:$0x3]  ;;  %v3463_v53 = vld [vmem:[%s4511_s0 + $0xe] sm:$0x3] }
 0x83f   :  { %v2010_v29 = vsel %vm4284_vm15, %v1928_v20, %v1976_v37  ;;  %v2011_v0 = vsel %vm4284_vm15, %v1932_v56, %v1980_v11  ;;  %v2012_v33 = vsel %vm4284_vm15, %v1936_v49, %v1984_v23  ;;  %v2014_v9 = vsel %vm4284_vm15, %v1944_v21, %v1992_v12  ;;  %v3456_v37 = vld [vmem:[%s4511_s0] sm:$0x3]  ;;  %v3458_v12 = vld [vmem:[%s4511_s0 + $0x4] sm:$0x3] }
 0x840   :  { %v2013_v36 = vsel %vm4284_vm15, %v1940_v22, %v1988_v47  ;;  %v2015_v43 = vsel %vm4284_vm15, %v1948_v28, %v1996_v42  ;;  %v2035_v18 = vcombine.low %v2008_v24, %v2009_v27  ;;  %v2036_v31 = vcombine.low %v2010_v29, %v2011_v0 }
 0x841   :  { %v2037_v46 = vcombine.low %v2012_v33, %v2013_v36  ;;  %v2038_v50 = vcombine.low %v2014_v9, %v2015_v43  ;;  %v3646_v9 = vmov 269488144   ;;  %v3647_v43 = vmov 842150450  }
 0x842   :  { %v2045_v51 = vrot.slane %v2035_v18, %v3849_v35  ;;  %v2052_v52 = vrot.slane %v2036_v31, %v3849_v35  ;;  %v2248_v36 = vunpack.c.l.s4 %v3646_v9  ;;  %v2255_v18 = vunpack.c.l.s4 %v3647_v43 }
 0x843   :  { %v2059_v40 = vrot.slane %v2037_v46, %v3849_v35  ;;  %v2066_v63 = vrot.slane %v2038_v50, %v3849_v35  ;;  %v3648_v31 = vmov 1414812756   ;;  %v3649_v50 = vmov 1987475062  }
 0x844   :  { %v2067_v10 = vcombine.low %v2045_v51, %v2052_v52  ;;  %v2262_v46 = vunpack.c.l.s4 %v3648_v31  ;;  %v2269_v51 = vunpack.c.l.s4 %v3649_v50  ;;  %v2249_v52 = vunpack.c.0.s8 %v2248_v36 }
 0x845   :  { %v2068_v30 = vcombine.low %v2059_v40, %v2066_v63  ;;  %v2256_v40 = vunpack.c.0.s8 %v2255_v18  ;;  %v3174_v18 = vld [vmem:[#allocation7] ss:$0 sm:$0xff] }
 0x846   :  { %v2075_v45 = vrot.slane %v2067_v10, %v3849_v35  ;;  %v2263_v63 = vunpack.c.0.s8 %v2262_v46  ;;  %v2270_v10 = vunpack.c.0.s8 %v2269_v51  ;;  %v3175_v46 = vld [vmem:[#allocation8] ss:$0 sm:$0xff]  ;;  %v2463_v50 = vcombine.high %v3174_v18, %v3174_v18 }
 0x847   :  { %v2082_v54 = vrot.slane %v2068_v30, %v3849_v35  ;;  %v4351_v30 = vsub.s32 %v2249_v52, %v3801_v5  ;;  %v2498_v51 = vcombine.high %v3175_v46, %v3175_v46  ;;  %v2470_v52 = vrot.slane %v3174_v18, %v3810_v8  ;;  %v3414_v18 = vld [vmem:[%s4518_s7 + $0x10] sm:$0xff]  }
 0x849   :  { %v2083_v55 = vcombine.low %v2075_v45, %v2082_v54  ;;  %v4354_v45 = vsub.s32 %v2256_v40, %v3801_v5  ;;  %v4357_v54 = vsub.s32 %v2263_v63, %v3801_v5  ;;  %v2477_v40 = vrot.slane %v2463_v50, %v3810_v8 }
 0x84a   :  { %v2505_v63 = vrot.slane %v3175_v46, %v3810_v8  ;;  %v3176_v46 = vld [vmem:[#allocation2] ss:$0 sm:$0xff] }
 0x84b   :  { %3343 = vmatmul.mubr.msk.bf16.vlgmr.msra.gmra.mrb[32].mxu1 %vm192_vm1, %v2083_v55  ;;  %v4360_v55 = vsub.s32 %v2270_v10, %v3801_v5  ;;  %v2512_v10 = vrot.slane %v2498_v51, %v3810_v8 }
 0x84c   :  { %3362 = vmatprep.mubr.msk.bf16.mxu1 %vm3635_vm0, %v3634_v1  ;;  %vm2681_vm0 = vcmask 523264  }
 0x91e   :  { %v2133_v60 = vpop.f32.mrb[32].mxu1 }
 0x91f   :  { %v2134_v61 = vadd.f32 %v3170_v57, %v2133_v60  ;;  %v3344_v62 = vpop.f32.mrb[33].mxu1 }
 0x920   :  { %v2136_v48 = vpop.f32.mrb[34].mxu1 }
 0x921   :  { %v2142_v32 = vcombine.high %v2134_v61, %v2134_v61  ;;  %v2149_v25 = vrot.slane %v2134_v61, %v3810_v8  ;;  %v2137_v58 = vadd.f32 %v3170_v57, %v2136_v48  ;;  %v3345_v3 = vpop.f32.mrb[35].mxu1 }
 0x923   :  { %v2156_v35 = vrot.slane %v2142_v32, %v3810_v8  ;;  %v2157_v4 = vcombine.high %v2149_v25, %v2149_v25  ;;  %v2159_v2 = vcombine.high %v2137_v58, %v2137_v58  ;;  %v2166_v6 = vrot.slane %v2137_v58, %v3810_v8 }
 0x924   :  { %v2184_v23 = vadd.f32 %v3456_v37, %v2149_v25 }
 0x925   :  { %v2158_v7 = vcombine.high %v2156_v35, %v2156_v35  ;;  %v2185_v41 = vadd.f32 %v3457_v59, %v2157_v4  ;;  %v2173_v11 = vrot.slane %v2159_v2, %v3810_v8  ;;  %v2174_v47 = vcombine.high %v2166_v6, %v2166_v6 }
 0x926   :  { %v2186_v44 = vadd.f32 %v3458_v12, %v2156_v35  ;;  %v2188_v17 = vadd.f32 %v3460_v38, %v2166_v6 }
 0x927   :  { %v2175_v14 = vcombine.high %v2173_v11, %v2173_v11  ;;  %v2187_v16 = vadd.f32 %v3459_v15, %v2158_v7  ;;  %v2200_v42 = vcombine.low %v2184_v23, %v2185_v41  ;;  %v2189_v26 = vadd.f32 %v3461_v39, %v2174_v47 }
 0x928   :  { %v2190_v34 = vadd.f32 %v3462_v13, %v2173_v11 }
 0x929   :  { %v2201_v19 = vcombine.low %v2186_v44, %v2187_v16  ;;  %v2191_v20 = vadd.f32 %v3463_v53, %v2175_v14  ;;  %v2217_v56 = vcombine.low %v2188_v17, %v2189_v26  ;;  %v2208_v49 = vrot.slane %v2200_v42, %v3810_v8 }
 0x92b   :  { %v2215_v21 = vrot.slane %v2201_v19, %v3810_v8  ;;  %v2218_v22 = vcombine.low %v2190_v34, %v2191_v20  ;;  %v2225_v24 = vrot.slane %v2217_v56, %v3810_v8 }
 0x92d   :  { %v2216_v28 = vcombine.low %v2208_v49, %v2215_v21  ;;  %v2232_v27 = vrot.slane %v2218_v22, %v3810_v8 }
 0x92f   :  { %v2236_v29 = vsel %vm192_vm1, %v2216_v28, 0.0  ;;  %v2233_v0 = vcombine.low %v2225_v24, %v2232_v27  ;;  %v3410_v28 = vld [vmem:[%s4516_s5] sm:$0xff]   ;;  %v3411_v24 = vld [vmem:[%s4516_s5 + $0x8] sm:$0xff]  }
 0x930   :  { %2237 = vadd.xlane.f32.xlu1 %v2236_v29  ;;  %3347 = vmatpush3.bf16.msra.mxu0 %v3410_v28  ;;  %v3412_v27 = vld [vmem:[%s4518_s7] sm:$0xff]   ;;  %v3413_v29 = vld [vmem:[%s4518_s7 + $0x8] sm:$0xff]  }
 0x931   :  { %v2239_v33 = vsel %vm192_vm1, %v2233_v0, 0.0  ;;  %3348 = vmatprep.subr.bf16.mxu0 %v3634_v1  ;;  %3355 = vmatpush3.bf16.msra.mxu1 %v3412_v27 }
 0x932   :  { %2240 = vadd.xlane.f32.xlu0 %v2239_v33  ;;  %3356 = vmatprep.subr.bf16.mxu1 %v3634_v1 }
 0x934   :  { %3349 = vmatpush3.bf16.msra.mxu0 %v3411_v24 }
 0x935   :  { %3357 = vmatpush3.bf16.msra.mxu1 %v3413_v29 }
 0x936   :  { %3358 = vmatprep.subr.bf16.mxu1 %v3634_v1 }
 0x939   :  { %3359 = vmatpush3.bf16.msra.mxu1 %v3414_v18 }
 0x93a   :  { %3360 = vmatprep.subr.bf16.mxu1 %v3634_v1 }
 0x9bd   :  { %v2238_v57 = vpop.xlane.xlu1 %2237 }
 0x9be   :  { %v2243_v60 = vmul.f32 0.03125, %v2238_v57 }
 0x9bf   :  { %v2241_v61 = vpop.xlane.xlu0 %2240 }
 0x9c0   :  { %v2253_v62 = vrot.slane %v2243_v60, %v4351_v30  ;;  %v2260_v48 = vrot.slane %v2243_v60, %v4354_v45  ;;  %v2267_v32 = vrot.slane %v2243_v60, %v4357_v54  ;;  %v2274_v25 = vrot.slane %v2243_v60, %v4360_v55 }
 0x9c1   :  { %v2244_v58 = vmul.f32 0.03125, %v2241_v61  ;;  %v2478_v60 = vcombine.high %v2470_v52, %v2470_v52  ;;  %v2479_v61 = vcombine.high %v2477_v40, %v2477_v40 }
 0x9c2   :  { %v4366_v3 = vsub.f32 %v2184_v23, %v2253_v62  ;;  %v4368_v35 = vsub.f32 %v2185_v41, %v2260_v48  ;;  %v4370_v4 = vsub.f32 %v2186_v44, %v2267_v32  ;;  %v4372_v5 = vsub.f32 %v2187_v16, %v2274_v25 }
 0x9c3   :  { %v2281_v2 = vrot.slane %v2244_v58, %v4351_v30  ;;  %v2288_v6 = vrot.slane %v2244_v58, %v4354_v45  ;;  %v2295_v7 = vrot.slane %v2244_v58, %v4357_v54  ;;  %v2302_v37 = vrot.slane %v2244_v58, %v4360_v55 }
 0x9c4   :  { %v2319_v59 = vmul.f32 %v4366_v3, %v4366_v3  ;;  %v2320_v23 = vmul.f32 %v4368_v35, %v4368_v35  ;;  %v2321_v41 = vmul.f32 %v4370_v4, %v4370_v4  ;;  %v2322_v11 = vmul.f32 %v4372_v5, %v4372_v5 }
 0x9c5   :  { %v4386_v47 = vsub.f32 %v2188_v17, %v2281_v2  ;;  %v4388_v12 = vsub.f32 %v2189_v26, %v2288_v6  ;;  %v4390_v44 = vsub.f32 %v2190_v34, %v2295_v7  ;;  %v4392_v14 = vsub.f32 %v2191_v20, %v2302_v37 }
 0x9c6   :  { %v2335_v15 = vcombine.low %v2319_v59, %v2320_v23  ;;  %v2336_v16 = vcombine.low %v2321_v41, %v2322_v11  ;;  %v2513_v58 = vcombine.high %v2505_v63, %v2505_v63  ;;  %v2514_v2 = vcombine.high %v2512_v10, %v2512_v10 }
 0x9c7   :  { %v2323_v42 = vmul.f32 %v4386_v47, %v4386_v47  ;;  %v2324_v38 = vmul.f32 %v4388_v12, %v4388_v12  ;;  %v2325_v39 = vmul.f32 %v4390_v44, %v4390_v44  ;;  %v2326_v17 = vmul.f32 %v4392_v14, %v4392_v14 }
 0x9c8   :  { %v2343_v26 = vrot.slane %v2335_v15, %v3810_v8  ;;  %v2350_v13 = vrot.slane %v2336_v16, %v3810_v8 }
 0x9c9   :  { %v2352_v34 = vcombine.low %v2323_v42, %v2324_v38  ;;  %v2353_v19 = vcombine.low %v2325_v39, %v2326_v17 }
 0x9ca   :  { %v2351_v53 = vcombine.low %v2343_v26, %v2350_v13 }
 0x9cb   :  { %v2360_v20 = vrot.slane %v2352_v34, %v3810_v8  ;;  %v2367_v56 = vrot.slane %v2353_v19, %v3810_v8 }
 0x9cc   :  { %v2371_v49 = vsel %vm192_vm1, %v2351_v53, 0.0 }
 0x9cd   :  { %2372 = vadd.xlane.f32.xlu0 %v2371_v49  ;;  %v2368_v21 = vcombine.low %v2360_v20, %v2367_v56 }
 0x9cf   :  { %v2374_v22 = vsel %vm192_vm1, %v2368_v21, 0.0 }
 0x9d0   :  { %2375 = vadd.xlane.f32.xlu1 %v2374_v22 }
 0xa5a   :  { %v2373_v0 = vpop.xlane.xlu0 %2372 }
 0xa5b   :  { %v2377_v33 = vmul.f32 0.03125, %v2373_v0 }
 0xa5d   :  { %v2379_v9 = vadd.f32 1e-05, %v2377_v33  ;;  %v2376_v36 = vpop.xlane.xlu1 %2375 }
 0xa5e   :  { %v2378_v43 = vmul.f32 0.03125, %v2376_v36 }
 0xa5f   :  { %3448 = vrsqrt.f32 %v2379_v9 }
 0xa60   :  { %v2380_v31 = vadd.f32 1e-05, %v2378_v43 }
 0xa62   :  { %3450 = vrsqrt.f32 %v2380_v31  ;;  %v3415_v31 = vld [vmem:[%s4518_s7 + $0x18] sm:$0xff]   ;;  %s3650_s7 = smov [#allocation13]  }
 0xa63   :  { %3361 = vmatpush3.bf16.msra.mxu1 %v3415_v31  ;;  %s3126_s20 = sshll.u32 %s3650_s7, 4  ;;  %s3127_s20 = int_to_ptr.vmem [resolvable:$true] %s3126_s20 }
 0xa64   :  { %s3596_s26 = scalar_lea.vmem %s3127_s20, 256  ;;  %p3601_p7 = scmp.lt.s32.totalorder %s3127_s20, %s3127_s20 }
 0xa65   :  { %p3597_p6 = scmp.ne.s32.totalorder %s3127_s20, %s3596_s26  ;;  %p3602_p8 = scmp.lt.s32.totalorder %s3596_s26, %s3596_s26 }
 0xa67   :  { %p3603_p9 = por %p3602_p8, %p3601_p7 }
 0xa69   :  { %v3449_v57 = vpop.eup %3448  ;;  %p3604_p10 = pnand %p3603_p9, %p3597_p6 }
 0xa6a   :  { %v2391_v62 = vrot.slane %v3449_v57, %v4351_v30  ;;  %v2398_v48 = vrot.slane %v3449_v57, %v4354_v45  ;;  %v2405_v32 = vrot.slane %v3449_v57, %v4357_v54  ;;  %v2412_v25 = vrot.slane %v3449_v57, %v4360_v55 }
 0xa6c   :  { %v3451_v6 = vpop.eup %3450  ;;  %v2449_v7 = vmul.f32 %v2391_v62, %v4366_v3  ;;  %v2450_v37 = vmul.f32 %v2398_v48, %v4368_v35  ;;  %v2451_v59 = vmul.f32 %v2405_v32, %v4370_v4  ;;  %v2452_v23 = vmul.f32 %v2412_v25, %v4372_v5  ;;  %v3180_v62 = vld [vmem:[#allocation5] ss:$0 sm:$0xff] }
 0xa6d   :  { %v2419_v41 = vrot.slane %v3451_v6, %v4351_v30  ;;  %v2426_v11 = vrot.slane %v3451_v6, %v4354_v45  ;;  %v2433_v15 = vrot.slane %v3451_v6, %v4357_v54  ;;  %v2440_v16 = vrot.slane %v3451_v6, %v4360_v55 }
 0xa6e   :  { %v2484_v42 = vmul.f32 %v2470_v52, %v2449_v7  ;;  %v2485_v38 = vmul.f32 %v2478_v60, %v2450_v37  ;;  %v2486_v39 = vmul.f32 %v2477_v40, %v2451_v59  ;;  %v2487_v17 = vmul.f32 %v2479_v61, %v2452_v23 }
 0xa6f   :  { %v2453_v3 = vmul.f32 %v2419_v41, %v4386_v47  ;;  %v2454_v35 = vmul.f32 %v2426_v11, %v4388_v12  ;;  %v2455_v4 = vmul.f32 %v2433_v15, %v4390_v44  ;;  %v2456_v5 = vmul.f32 %v2440_v16, %v4392_v14 }
 0xa70   :  { %v2519_v26 = vadd.f32 %v2505_v63, %v2484_v42  ;;  %v2520_v13 = vadd.f32 %v2513_v58, %v2485_v38  ;;  %v2521_v34 = vadd.f32 %v2512_v10, %v2486_v39  ;;  %v2522_v19 = vadd.f32 %v2514_v2, %v2487_v17 }
 0xa71   :  { %v2488_v53 = vmul.f32 %v2470_v52, %v2453_v3  ;;  %v2489_v20 = vmul.f32 %v2478_v60, %v2454_v35  ;;  %v2490_v56 = vmul.f32 %v2477_v40, %v2455_v4  ;;  %v2491_v49 = vmul.f32 %v2479_v61, %v2456_v5 }
 0xa72   :  { %v2535_v21 = vcombine.low %v2519_v26, %v2520_v13  ;;  %v2536_v22 = vcombine.low %v2521_v34, %v2522_v19 }
 0xa73   :  { %v2523_v28 = vadd.f32 %v2505_v63, %v2488_v53  ;;  %v2524_v24 = vadd.f32 %v2513_v58, %v2489_v20  ;;  %v2525_v27 = vadd.f32 %v2512_v10, %v2490_v56  ;;  %v2526_v47 = vadd.f32 %v2514_v2, %v2491_v49 }
 0xa74   :  { %v2543_v12 = vrot.slane %v2535_v21, %v3810_v8  ;;  %v2550_v44 = vrot.slane %v2536_v22, %v3810_v8 }
 0xa75   :  { %v2552_v29 = vcombine.low %v2523_v28, %v2524_v24  ;;  %v2553_v14 = vcombine.low %v2525_v27, %v2526_v47 }
 0xa76   :  { %v2551_v9 = vcombine.low %v2543_v12, %v2550_v44 }
 0xa77   :  { %v2560_v0 = vrot.slane %v2552_v29, %v3810_v8  ;;  %v2567_v33 = vrot.slane %v2553_v14, %v3810_v8 }
 0xa79   :  { %v2568_v36 = vcombine.low %v2560_v0, %v2567_v33 }
 0xa7b   :  { %v2571_v43 = vpack.c.bf16 %v2568_v36, %v2551_v9 }
 0xa7d   :  { %3351 = vmatmul.mubr.msk.bf16.vlgmr.msra.gmra.mrb[36].mxu0 %vm192_vm1, %v2571_v43 }
 0xb50   :  { %v2632_v50 = vpop.f32.mrb[36].mxu0 }
 0xb51   :  { %v2633_v51 = vadd.f32 %v3176_v46, %v2632_v50  ;;  %v3352_v52 = vpop.f32.mrb[37].mxu0 }
 0xb52   :  { %v2635_v40 = vpop.f32.mrb[38].mxu0 }
 0xb53   :  { %v2636_v63 = vadd.f32 %v3176_v46, %v2635_v40  ;;  %v3353_v10 = vpop.f32.mrb[39].mxu0  ;;  %v2639_v57 = vmax.f32 %v2633_v51, 0.0 }
 0xb55   :  { %v2640_v60 = vmax.f32 %v2636_v63, 0.0 }
 0xb57   :  { %v2641_v61 = vpack.c.bf16 %v2640_v60, %v2639_v57 }
 0xb59   :  { %3363 = vmatmul.mubr.msk.bf16.vlgmr.msra.gmra.mrb[36].mxu1 %vm2681_vm0, %v2641_v61 }
 0xc2c   :  { %v2719_v48 = vpop.f32.mrb[36].mxu1 }
 0xc2d   :  { %v2720_v1 = vadd.f32 %v3180_v62, %v2719_v48  ;;  %v3364_v32 = vpop.f32.mrb[37].mxu1 }
 0xc2e   :  { %v2722_v25 = vpop.f32.mrb[38].mxu1 }
 0xc2f   :  { %v2728_v58 = vcombine.high %v2720_v1, %v2720_v1  ;;  %v2735_v2 = vrot.slane %v2720_v1, %v3810_v8  ;;  %v2723_v6 = vadd.f32 %v3180_v62, %v2722_v25  ;;  %v3365_v7 = vpop.f32.mrb[39].mxu1 }
 0xc31   :  { %v2742_v37 = vrot.slane %v2728_v58, %v3810_v8  ;;  %v2743_v59 = vcombine.high %v2735_v2, %v2735_v2  ;;  %v2745_v23 = vcombine.high %v2723_v6, %v2723_v6  ;;  %v2752_v41 = vrot.slane %v2723_v6, %v3810_v8 }
 0xc32   :  { %v2770_v15 = vadd.f32 %v2735_v2, %v2519_v26 }
 0xc33   :  { %v2744_v11 = vcombine.high %v2742_v37, %v2742_v37  ;;  %v2771_v16 = vadd.f32 %v2743_v59, %v2520_v13  ;;  %v2759_v42 = vrot.slane %v2745_v23, %v3810_v8  ;;  %v2760_v38 = vcombine.high %v2752_v41, %v2752_v41 }
 0xc34   :  { %v2772_v39 = vadd.f32 %v2742_v37, %v2521_v34  ;;  %v2774_v4 = vadd.f32 %v2752_v41, %v2523_v28 }
 0xc35   :  { %v2761_v17 = vcombine.high %v2759_v42, %v2759_v42  ;;  %v2773_v3 = vadd.f32 %v2744_v11, %v2522_v19  ;;  %v2786_v35 = vcombine.low %v2770_v15, %v2771_v16  ;;  %v2775_v5 = vadd.f32 %v2760_v38, %v2524_v24 }
 0xc36   :  { %v2776_v53 = vadd.f32 %v2759_v42, %v2525_v27 }
 0xc37   :  { %v2787_v20 = vcombine.low %v2772_v39, %v2773_v3  ;;  %v2777_v56 = vadd.f32 %v2761_v17, %v2526_v47  ;;  %v2803_v49 = vcombine.low %v2774_v4, %v2775_v5  ;;  %v2794_v21 = vrot.slane %v2786_v35, %v3810_v8 }
 0xc39   :  { %v2801_v22 = vrot.slane %v2787_v20, %v3810_v8  ;;  %v2804_v12 = vcombine.low %v2776_v53, %v2777_v56  ;;  %v2811_v13 = vrot.slane %v2803_v49, %v3810_v8  ;;  %v3187_v20 = vld [vmem:[#allocation11] ss:$0 sm:$0xff] }
 0xc3a   :  { %v3083_v49 = vcombine.high %v3187_v20, %v3187_v20 }
 0xc3b   :  { %v2802_v26 = vcombine.low %v2794_v21, %v2801_v22  ;;  %v2818_v44 = vrot.slane %v2804_v12, %v3810_v8  ;;  %v3090_v12 = vrot.slane %v3187_v20, %v3810_v8 }
 0xc3d   :  { %v2822_v34 = vsel %vm192_vm1, %v2802_v26, 0.0  ;;  %v2819_v19 = vcombine.low %v2811_v13, %v2818_v44  ;;  %v3097_v26 = vrot.slane %v3083_v49, %v3810_v8 }
 0xc3e   :  { %2823 = vadd.xlane.f32.xlu0 %v2822_v34 }
 0xc3f   :  { %v2825_v28 = vsel %vm192_vm1, %v2819_v19, 0.0 }
 0xc40   :  { %2826 = vadd.xlane.f32.xlu1 %v2825_v28 }
 0xccb   :  { %v2824_v24 = vpop.xlane.xlu0 %2823 }
 0xccc   :  { %v2828_v27 = vmul.f32 0.03125, %v2824_v24 }
 0xccd   :  { %v2827_v47 = vpop.xlane.xlu1 %2826 }
 0xcce   :  { %v2838_v29 = vrot.slane %v2828_v27, %v4351_v30  ;;  %v2845_v14 = vrot.slane %v2828_v27, %v4354_v45  ;;  %v2852_v0 = vrot.slane %v2828_v27, %v4357_v54  ;;  %v2859_v33 = vrot.slane %v2828_v27, %v4360_v55 }
 0xccf   :  { %v2829_v9 = vmul.f32 0.03125, %v2827_v47  ;;  %v3098_v47 = vcombine.high %v3090_v12, %v3090_v12 }
 0xcd0   :  { %v2896_v36 = vsub.f32 %v2770_v15, %v2838_v29  ;;  %v2897_v43 = vsub.f32 %v2771_v16, %v2845_v14  ;;  %v2898_v18 = vsub.f32 %v2772_v39, %v2852_v0  ;;  %v2899_v31 = vsub.f32 %v2773_v3, %v2859_v33 }
 0xcd1   :  { %v2866_v46 = vrot.slane %v2829_v9, %v4351_v30  ;;  %v2873_v50 = vrot.slane %v2829_v9, %v4354_v45  ;;  %v2880_v51 = vrot.slane %v2829_v9, %v4357_v54  ;;  %v2887_v52 = vrot.slane %v2829_v9, %v4360_v55 }
 0xcd2   :  { %v2904_v40 = vmul.f32 %v2896_v36, %v2896_v36  ;;  %v2905_v63 = vmul.f32 %v2897_v43, %v2897_v43  ;;  %v2906_v10 = vmul.f32 %v2898_v18, %v2898_v18  ;;  %v2907_v57 = vmul.f32 %v2899_v31, %v2899_v31 }
 0xcd3   :  { %v2900_v60 = vsub.f32 %v2774_v4, %v2866_v46  ;;  %v2901_v61 = vsub.f32 %v2775_v5, %v2873_v50  ;;  %v2902_v62 = vsub.f32 %v2776_v53, %v2880_v51  ;;  %v2903_v48 = vsub.f32 %v2777_v56, %v2887_v52  ;;  %v3186_v5 = vld [vmem:[#allocation10] ss:$0 sm:$0xff] }
 0xcd4   :  { %v2920_v1 = vcombine.low %v2904_v40, %v2905_v63  ;;  %v2921_v32 = vcombine.low %v2906_v10, %v2907_v57  ;;  %v3048_v56 = vcombine.high %v3186_v5, %v3186_v5  ;;  %v3055_v21 = vrot.slane %v3186_v5, %v3810_v8 }
 0xcd5   :  { %v2908_v25 = vmul.f32 %v2900_v60, %v2900_v60  ;;  %v2909_v58 = vmul.f32 %v2901_v61, %v2901_v61  ;;  %v2910_v2 = vmul.f32 %v2902_v62, %v2902_v62  ;;  %v2911_v6 = vmul.f32 %v2903_v48, %v2903_v48 }
 0xcd6   :  { %v2928_v7 = vrot.slane %v2920_v1, %v3810_v8  ;;  %v2935_v37 = vrot.slane %v2921_v32, %v3810_v8  ;;  %v3062_v22 = vrot.slane %v3048_v56, %v3810_v8  ;;  %v3063_v44 = vcombine.high %v3055_v21, %v3055_v21 }
 0xcd7   :  { %v2937_v59 = vcombine.low %v2908_v25, %v2909_v58  ;;  %v2938_v23 = vcombine.low %v2910_v2, %v2911_v6  ;;  %v3099_v29 = vcombine.high %v3097_v26, %v3097_v26 }
 0xcd8   :  { %v2936_v41 = vcombine.low %v2928_v7, %v2935_v37  ;;  %v3064_v34 = vcombine.high %v3062_v22, %v3062_v22 }
 0xcd9   :  { %v2945_v11 = vrot.slane %v2937_v59, %v3810_v8  ;;  %v2952_v15 = vrot.slane %v2938_v23, %v3810_v8 }
 0xcda   :  { %v2956_v16 = vsel %vm192_vm1, %v2936_v41, 0.0 }
 0xcdb   :  { %2957 = vadd.xlane.f32.xlu0 %v2956_v16  ;;  %v2953_v42 = vcombine.low %v2945_v11, %v2952_v15 }
 0xcdd   :  { %v2959_v38 = vsel %vm192_vm1, %v2953_v42, 0.0  ;;  %vm3112_vm1 = vcmask 254976  }
 0xcde   :  { %2960 = vadd.xlane.f32.xlu1 %v2959_v38 }
 0xd68   :  { %v2958_v39 = vpop.xlane.xlu0 %2957 }
 0xd69   :  { %v2962_v17 = vmul.f32 0.03125, %v2958_v39 }
 0xd6b   :  { %v2964_v3 = vadd.f32 1e-05, %v2962_v17  ;;  %v2961_v35 = vpop.xlane.xlu1 %2960 }
 0xd6c   :  { %v2963_v4 = vmul.f32 0.03125, %v2961_v35 }
 0xd6d   :  { %3452 = vrsqrt.f32 %v2964_v3 }
 0xd6e   :  { %v2965_v53 = vadd.f32 1e-05, %v2963_v4 }
 0xd70   :  { %3454 = vrsqrt.f32 %v2965_v53 }
 0xd77   :  { %v3453_v13 = vpop.eup %3452 }
 0xd78   :  { %v2976_v19 = vrot.slane %v3453_v13, %v4351_v30  ;;  %v2983_v28 = vrot.slane %v3453_v13, %v4354_v45  ;;  %v2990_v24 = vrot.slane %v3453_v13, %v4357_v54  ;;  %v2997_v27 = vrot.slane %v3453_v13, %v4360_v55 }
 0xd7a   :  { %v3455_v14 = vpop.eup %3454  ;;  %v3034_v0 = vmul.f32 %v2976_v19, %v2896_v36  ;;  %v3035_v33 = vmul.f32 %v2983_v28, %v2897_v43  ;;  %v3036_v9 = vmul.f32 %v2990_v24, %v2898_v18  ;;  %v3037_v46 = vmul.f32 %v2997_v27, %v2899_v31 }
 0xd7b   :  { %v3004_v8 = vrot.slane %v3455_v14, %v4351_v30  ;;  %v3011_v50 = vrot.slane %v3455_v14, %v4354_v45  ;;  %v3018_v51 = vrot.slane %v3455_v14, %v4357_v54  ;;  %v3025_v52 = vrot.slane %v3455_v14, %v4360_v55 }
 0xd7c   :  { %v3069_v40 = vmul.f32 %v3055_v21, %v3034_v0  ;;  %v3070_v63 = vmul.f32 %v3063_v44, %v3035_v33  ;;  %v3071_v10 = vmul.f32 %v3062_v22, %v3036_v9  ;;  %v3072_v57 = vmul.f32 %v3064_v34, %v3037_v46 }
 0xd7d   :  { %v3038_v1 = vmul.f32 %v3004_v8, %v2900_v60  ;;  %v3039_v32 = vmul.f32 %v3011_v50, %v2901_v61  ;;  %v3040_v25 = vmul.f32 %v3018_v51, %v2902_v62  ;;  %v3041_v58 = vmul.f32 %v3025_v52, %v2903_v48 }
 0xd7e   :  { %v3104_v36 = vadd.f32 %v3090_v12, %v3069_v40  ;;  %v3105_v43 = vadd.f32 %v3098_v47, %v3070_v63  ;;  %v3106_v18 = vadd.f32 %v3097_v26, %v3071_v10  ;;  %v3107_v31 = vadd.f32 %v3099_v29, %v3072_v57 }
 0xd7f   :  { %v3073_v30 = vmul.f32 %v3055_v21, %v3038_v1  ;;  %v3074_v45 = vmul.f32 %v3063_v44, %v3039_v32  ;;  %v3075_v2 = vmul.f32 %v3062_v22, %v3040_v25  ;;  %v3076_v54 = vmul.f32 %v3064_v34, %v3041_v58 }
 0xd80   :  { %3113 = vst.msk [vmem:[#allocation13] sm:$0x3] %vm3112_vm1, %v3104_v36  ;;  %3114 = vst.msk [vmem:[#allocation13 + $0x2] sm:$0x3] %vm3112_vm1, %v3105_v43 }
 0xd81   :  { %3115 = vst.msk [vmem:[#allocation13 + $0x4] sm:$0x3] %vm3112_vm1, %v3106_v18  ;;  %3116 = vst.msk [vmem:[#allocation13 + $0x6] sm:$0x3] %vm3112_vm1, %v3107_v31  ;;  %v3108_v55 = vadd.f32 %v3090_v12, %v3073_v30  ;;  %v3109_v60 = vadd.f32 %v3098_v47, %v3074_v45  ;;  %v3110_v61 = vadd.f32 %v3097_v26, %v3075_v2 }
 0xd82   :  { %v3111_v62 = vadd.f32 %v3099_v29, %v3076_v54 }
 0xd83   :  { %3117 = vst.msk [vmem:[#allocation13 + $0x8] sm:$0x3] %vm3112_vm1, %v3108_v55  ;;  %3118 = vst.msk [vmem:[#allocation13 + $0xa] sm:$0x3] %vm3112_vm1, %v3109_v60 }
 0xd84   :  { %3119 = vst.msk [vmem:[#allocation13 + $0xc] sm:$0x3] %vm3112_vm1, %v3110_v61  ;;  %3120 = vst.msk [vmem:[#allocation13 + $0xe] sm:$0x3] %vm3112_vm1, %v3111_v62 }
 0xd85   :  { %3607 = shalt.err (!%p3604_p10)
}
 0xd86   :  { %s3608_s17 = scalar_lea.hbm %s4524_s13, 256 }
 0xd87   :  { %p3609_p11 = scmp.ne.s32.totalorder %s4524_s13, %s3608_s17  ;;  %p3612_p12 = scmp.lt.u32.totalorder %s3608_s17, %s4524_s13 }
 0xd89   :  { %p3614_p13 = pnand %p3612_p12, %p3609_p11 }
 0xd8b   :  { %3617 = shalt.err (!%p3614_p13)
}
 0xd8c   :  { %s3651_s6 = smov 32   ;;  %s3652_s18 = smov 2  }
 0xd8d   :  { %3132 = dma.vmem_to_hbm [thread:$0]  %s3127_s20, 256, %s4524_s13, [#allocation4], %s3651_s6, %s3651_s6, %s3652_s18  }
 0xd8e   :  { %3626 = dma.done.wait [#allocation4], 256  }
 0xd8f   :  { %3627 = vsyncadd [#allocation4], 4294967040 }
 0xd90   :  { %3136 = vsyncpa [#allocation3], 1 }
 0xd91   :  { %3137 = vsyncpa [#allocation6], 1 }
 0xd92   :  { %3138 = vsyncpa [#allocation9], 1 }
 0xd93   :  { %3139 = vsyncpa [#allocation12], 1 }
 0xd94   :  { %3140 = vsyncpa [#allocation4], 1 }

</bundles_post_ra>
